<compile_context>
chip_gen: v6e
topology: v6e:2x2x1
jax: 0.10.0
libtpu: 0.0.40
codegen_flags: <defaults>
</compile_context>

<pallas_src>
import functools

import jax
import jax.numpy as jnp
from jax.experimental import pallas as pl
from jax.experimental.pallas import tpu as pltpu

WORD_DEPTH = 600   # stand-in for WINDOW_SIZE * TOTAL_LETTER_GRAMS = 90000
K = 300            # conv output channels (real value, kept unpadded in HBM)
L = 128            # semantic dim
J = 4              # number of negatives
SEQ_Q = 8          # query length
SEQ_D = 16         # doc length
DEPTH_TILE = 256   # depth (reduction) tile; real sizes: see per-generation notes above


def _round_up(x, mult):
    return ((x + mult - 1) // mult) * mult


# ----------------------------------------------------------------------------
# Fused two-tower kernel: depth-tiled conv matmul + epilogue
#   (bias, tanh, k-max(k=1) pooling over seq, semantic layer).
# Grid: (tower, depth_tiles); tower axis is "parallel" (v7x dual-TC), depth is
# the reduction ("arbitrary", last) with a resident f32 accumulator.
# ----------------------------------------------------------------------------
def _cdssm_tower_kernel(x_ref, wc_ref, bc_ref, ws_ref, bs_ref, out_ref, acc_ref,
                        *, q_n, q_seq, d_n, d_seq):
    t = pl.program_id(0)          # tower: 0 = query, 1 = doc
    d = pl.program_id(1)          # depth-reduction step

    @pl.when(d == 0)
    def _():
        acc_ref[...] = jnp.zeros_like(acc_ref)

    # Stream one depth tile: f32 activations cast to bf16 per tile in-kernel
    # (single HBM read of the activations), bf16 weights, f32 MXU accumulation.
    acc_ref[...] += jnp.dot(x_ref[0].astype(jnp.bfloat16), wc_ref[0],
                            preferred_element_type=jnp.float32)

    @pl.when(d == pl.num_programs(1) - 1)
    def _():
        n_max = out_ref.shape[1]
        l_dim = out_ref.shape[2]
        k_dim = acc_ref.shape[-1]
        bc = bc_ref[0]            # (1, K)
        ws = ws_ref[0]            # (K, L) bf16
        bs = bs_ref[0]            # (1, L)

        def tower_epilogue(rows, n_seqs, seq_len):
            c = jnp.tanh(rows + bc)                                       # (n*seq, K)
            kmax = jnp.max(c.reshape(n_seqs, seq_len, k_dim), axis=1)     # (n, K)
            return jnp.tanh(jnp.dot(kmax.astype(ws.dtype), ws,
                                    preferred_element_type=jnp.float32) + bs)

        @pl.when(t == 0)          # query tower (only the first q_n*q_seq rows are real)
        def _():
            s = tower_epilogue(acc_ref[0:q_n * q_seq, :], q_n, q_seq)      # (q_n, L)
            pad = n_max - q_n
            if pad:
                s = jnp.concatenate(
                    [s, jnp.zeros((pad, l_dim), jnp.float32)], axis=0)
            out_ref[0] = s

        @pl.when(t == 1)          # doc tower
        def _():
            out_ref[0] = tower_epilogue(acc_ref[0:d_n * d_seq, :], d_n, d_seq)


def cdssm_towers(x_all, wc_all, bc_all, ws_all, bs_all, *,
                 q_n, q_seq, d_n, d_seq, depth_tile):
    """x_all: (2, M, Dp) f32, wc_all: (2, Dp, K) bf16 -> (2, n_max, L) f32."""
    two, m, dp = x_all.shape
    k_dim = wc_all.shape[-1]
    l_dim = ws_all.shape[-1]
    n_max = max(q_n, d_n)
    assert two == 2
    assert depth_tile % 128 == 0 and dp % depth_tile == 0, (dp, depth_tile)
    assert m % 8 == 0 and m >= max(q_n * q_seq, d_n * d_seq)

    kernel = functools.partial(_cdssm_tower_kernel,
                               q_n=q_n, q_seq=q_seq, d_n=d_n, d_seq=d_seq)

    # Advisory cost estimate so XLA schedules the surrounding small ops sanely
    # around a long, DMA-bound custom call.
    cost = pl.CostEstimate(
        flops=2 * 2 * m * dp * k_dim + 2 * 2 * n_max * k_dim * l_dim,
        transcendentals=2 * (m * k_dim + n_max * l_dim),
        bytes_accessed=(x_all.size * 4 + wc_all.size * 2 + bc_all.size * 4 +
                        ws_all.size * 2 + bs_all.size * 4 +
                        2 * n_max * l_dim * 4))

    return pl.pallas_call(
        kernel,
        out_shape=jax.ShapeDtypeStruct((2, n_max, l_dim), jnp.float32),
        grid_spec=pltpu.PrefetchScalarGridSpec(
            num_scalar_prefetch=0,
            grid=(2, dp // depth_tile),                 # (tower, depth reduction)
            in_specs=[
                # activations tile (f32, cast per tile in-kernel)
                pl.BlockSpec((1, m, depth_tile), lambda t, d: (t, 0, d)),
                # streamed conv weight tile; last block dim == full K (unpadded)
                pl.BlockSpec((1, depth_tile, k_dim), lambda t, d: (t, d, 0)),
                pl.BlockSpec((1, 1, k_dim), lambda t, d: (t, 0, 0)),      # conv bias
                pl.BlockSpec((1, k_dim, l_dim), lambda t, d: (t, 0, 0)),  # sem weight
                pl.BlockSpec((1, 1, l_dim), lambda t, d: (t, 0, 0)),      # sem bias
            ],
            out_specs=pl.BlockSpec((1, n_max, l_dim), lambda t, d: (t, 0, 0)),
            scratch_shapes=[pltpu.VMEM((m, k_dim), jnp.float32)],
        ),
        compiler_params=pltpu.CompilerParams(
            # tower axis parallel (v7x: one tower per TensorCore), depth is the
            # reduction.  At real sizes set vmem_limit_bytes here if tk pushes
            # the double-buffered working set past the per-chip scoped default.
            dimension_semantics=("parallel", "arbitrary")),
        cost_estimate=cost,
    )(x_all, wc_all, bc_all, ws_all, bs_all)


# ----------------------------------------------------------------------------
# Full CDSSM forward: one fused pallas_call + trivial plain-JAX score.
# ----------------------------------------------------------------------------
@functools.partial(jax.jit, static_argnames=("depth_tile",))
def cdssm_forward(q, pos, negs, params, depth_tile=DEPTH_TILE):
    """q: (1, seq_q, depth); pos/negs[i]: (1, seq_d, depth)  ->  (J+1, 1, 1)."""
    (wc_q, bc_q, ws_q, bs_q, wc_d, bc_d, ws_d, bs_d, gw, gb) = params
    q_n, q_seq, depth = q.shape

    # NOTE: at real sizes callers should pre-stack the docs and pre-stack /
    # pre-cast the tower weights ONCE outside the per-step forward so these
    # copies do not recur every call.
    docs = jnp.concatenate([pos] + list(negs), axis=0)           # (J+1, seq_d, depth)
    d_n, d_seq, _ = docs.shape

    m = _round_up(max(q_n * q_seq, d_n * d_seq), 8)
    tk = min(depth_tile, _round_up(depth, 128))
    tk = max(128, (tk // 128) * 128)
    dp = _round_up(depth, tk)                                    # explicit depth pad

    def rows(x, n_rows):            # flatten to (rows, depth), zero-pad rows + depth
        x2 = x.reshape(n_rows, depth)
        return jnp.pad(x2, ((0, m - n_rows), (0, dp - depth)))

    # Activations stay float32 (the kernel casts per depth tile).  The padded
    # query rows are free headroom for batching more queries per launch.
    x_all = jnp.stack([rows(q, q_n * q_seq), rows(docs, d_n * d_seq)])   # (2, m, dp)

    pad_w = lambda w: jnp.pad(w, ((0, dp - depth), (0, 0)))
    wc_all = jnp.stack([pad_w(wc_q), pad_w(wc_d)]).astype(jnp.bfloat16)  # (2, dp, K)
    bc_all = jnp.stack([bc_q, bc_d])                                     # (2, 1, K)
    ws_all = jnp.stack([ws_q, ws_d]).astype(jnp.bfloat16)                # (2, K, L)
    bs_all = jnp.stack([bs_q, bs_d])                                     # (2, 1, L)

    s_all = cdssm_towers(x_all, wc_all, bc_all, ws_all, bs_all,
                         q_n=q_n, q_seq=q_seq, d_n=d_n, d_seq=d_seq,
                         depth_tile=tk)

    q_s = s_all[0, 0]                 # (L,)
    docs_s = s_all[1]                 # (J+1, L)
    dots = docs_s @ q_s               # (J+1,)
    # learn_gamma = Conv1d(1, 1, 1) applied to a (J+1, 1, 1) tensor == scalar affine.
    with_gamma = dots * gw + gb
    return with_gamma.reshape(d_n, 1, 1)


# Pure-JAX reference with the same bf16 matmul precision as the kernel
# (kernel-parity check; not a f32-numerics sign-off for the bf16 casts).
def cdssm_reference(q, pos, negs, params):
    (wc_q, bc_q, ws_q, bs_q, wc_d, bc_d, ws_d, bs_d, gw, gb) = params

    def tower(x, wc, bc, ws, bs):
        c = jnp.tanh(jnp.dot(x.astype(jnp.bfloat16), wc.astype(jnp.bfloat16),
                             preferred_element_type=jnp.float32) + bc)      # (seq, K)
        kmax = jnp.max(c, axis=0, keepdims=True)                            # k-max, k=1
        s = jnp.tanh(jnp.dot(kmax.astype(jnp.bfloat16), ws.astype(jnp.bfloat16),
                             preferred_element_type=jnp.float32) + bs)      # (1, L)
        return s[0]

    q_s = tower(q[0], wc_q, bc_q, ws_q, bs_q)
    doc_list = [pos] + list(negs)
    ss = [tower(d[0], wc_d, bc_d, ws_d, bs_d) for d in doc_list]
    dots = jnp.stack([jnp.sum(q_s * s) for s in ss])
    return (dots * gw + gb).reshape(J + 1, 1, 1)


if __name__ == "__main__":
    key = jax.random.PRNGKey(0)
    keys = jax.random.split(key, 16)

    # Deterministic synthetic parameters (pre-transposed for channels-last matmuls:
    # wc == conv.weight[:, :, 0].T, ws == linear.weight.T).
    scale = 0.05
    wc_q = scale * jax.random.normal(keys[0], (WORD_DEPTH, K), jnp.float32)
    bc_q = scale * jax.random.normal(keys[1], (1, K), jnp.float32)
    ws_q = scale * jax.random.normal(keys[2], (K, L), jnp.float32)
    bs_q = scale * jax.random.normal(keys[3], (1, L), jnp.float32)
    wc_d = scale * jax.random.normal(keys[4], (WORD_DEPTH, K), jnp.float32)
    bc_d = scale * jax.random.normal(keys[5], (1, K), jnp.float32)
    ws_d = scale * jax.random.normal(keys[6], (K, L), jnp.float32)
    bs_d = scale * jax.random.normal(keys[7], (1, L), jnp.float32)
    gw = jax.random.normal(keys[8], (), jnp.float32)     # learn_gamma.weight (scalar)
    gb = jax.random.normal(keys[9], (), jnp.float32)     # learn_gamma.bias   (scalar)
    params = (wc_q, bc_q, ws_q, bs_q, wc_d, bc_d, ws_d, bs_d, gw, gb)

    # Inputs (channels-last, matching the module's transpose(1, 2) layout).
    q = jax.random.normal(keys[10], (1, SEQ_Q, WORD_DEPTH), jnp.float32)
    pos = jax.random.normal(keys[11], (1, SEQ_D, WORD_DEPTH), jnp.float32)
    negs = [jax.random.normal(keys[12 + i], (1, SEQ_D, WORD_DEPTH), jnp.float32)
            for i in range(J)]

    out = jax.block_until_ready(cdssm_forward(q, pos, negs, params))
    ref = cdssm_reference(q, pos, negs, params)

    assert out.shape == (J + 1, 1, 1), out.shape
    assert jnp.allclose(out, ref, atol=5e-3, rtol=5e-3), (out, ref)

    print("KERNEL_OK")
</pallas_src>

<mosaic_0001>
module attributes {stable_mosaic.version = 11 : i64} {
  func.func @_cdssm_tower_kernel(%arg0: i32, %arg1: i32, %arg2: memref<1x80x256xf32, #tpu.memory_space<vmem>>, %arg3: memref<1x256x300xbf16, #tpu.memory_space<vmem>>, %arg4: memref<1x1x300xf32, #tpu.memory_space<vmem>>, %arg5: memref<1x300x128xbf16, #tpu.memory_space<vmem>>, %arg6: memref<1x1x128xf32, #tpu.memory_space<vmem>>, %arg7: memref<1x5x128xf32, #tpu.memory_space<vmem>>, %arg8: memref<80x300xf32, #tpu.memory_space<vmem>>) attributes {dimension_semantics = [#tpu.dimension_semantics<parallel>, #tpu.dimension_semantics<arbitrary>], iteration_bounds = array<i64: 2, 3>, scalar_prefetch = 0 : i64, scratch_operands = 1 : i64, tpu.core_type = #tpu.core_type<tc>, window_params = [{transform_indices = @transform_0, window_bounds = array<i64: 1, 80, 256>}, {transform_indices = @transform_1, window_bounds = array<i64: 1, 256, 300>}, {transform_indices = @transform_2, window_bounds = array<i64: 1, 1, 300>}, {transform_indices = @transform_3, window_bounds = array<i64: 1, 300, 128>}, {transform_indices = @transform_4, window_bounds = array<i64: 1, 1, 128>}, {transform_indices = @transform_5, window_bounds = array<i64: 1, 5, 128>}]} {
    %c0_i32 = arith.constant 0 : i32
    %0 = arith.cmpi eq, %arg1, %c0_i32 : i32
    %1 = arith.extui %0 : i1 to i32
    %c0_i32_0 = arith.constant 0 : i32
    %2 = arith.cmpi ne, %1, %c0_i32_0 : i32
    scf.if %2 {
      %cst_11 = arith.constant 0.000000e+00 : f32
      %15 = vector.broadcast %cst_11 : f32 to vector<80x300xf32>
      %c0_12 = arith.constant 0 : index
      %c0_13 = arith.constant 0 : index
      %16 = vector.load %arg8[%c0_12, %c0_13] : memref<80x300xf32, #tpu.memory_space<vmem>>, vector<80x300xf32>
      tpu.vector_store %arg8[%c0_12, %c0_13], %15 {strides = array<i32>} : memref<80x300xf32, #tpu.memory_space<vmem>>, vector<80x300xf32>,
    } else {
    }
    %c0 = arith.constant 0 : index
    %c0_1 = arith.constant 0 : index
    %3 = vector.load %arg8[%c0, %c0_1] : memref<80x300xf32, #tpu.memory_space<vmem>>, vector<80x300xf32>
    %c0_2 = arith.constant 0 : index
    %c0_3 = arith.constant 0 : index
    %c0_4 = arith.constant 0 : index
    %4 = vector.load %arg2[%c0_2, %c0_3, %c0_4] : memref<1x80x256xf32, #tpu.memory_space<vmem>>, vector<1x80x256xf32>
    %5 = vector.shape_cast %4 : vector<1x80x256xf32> to vector<80x256xf32>
    %6 = arith.truncf %5 : vector<80x256xf32> to vector<80x256xbf16>
    %c0_5 = arith.constant 0 : index
    %c0_6 = arith.constant 0 : index
    %c0_7 = arith.constant 0 : index
    %7 = vector.load %arg3[%c0_5, %c0_6, %c0_7] : memref<1x256x300xbf16, #tpu.memory_space<vmem>>, vector<1x256x300xbf16>
    %8 = vector.shape_cast %7 : vector<1x256x300xbf16> to vector<256x300xbf16>
    %cst = arith.constant dense<0.000000e+00> : vector<80x300xf32>
    %9 = tpu.matmul %6, %8, %cst {dimension_numbers = #tpu.dot_dimension_numbers<[1], [0], [0], [1], [0, 0, 1, 1], [], []>} : vector<80x256xbf16>, vector<256x300xbf16>, vector<80x300xf32> -> vector<80x300xf32>
    %10 = arith.addf %3, %9 : vector<80x300xf32>
    %c0_8 = arith.constant 0 : index
    %c0_9 = arith.constant 0 : index
    %11 = vector.load %arg8[%c0_8, %c0_9] : memref<80x300xf32, #tpu.memory_space<vmem>>, vector<80x300xf32>
    tpu.vector_store %arg8[%c0_8, %c0_9], %10 {strides = array<i32>} : memref<80x300xf32, #tpu.memory_space<vmem>>, vector<80x300xf32>,
    %c2_i32 = arith.constant 2 : i32
    %12 = arith.cmpi eq, %arg1, %c2_i32 : i32
    %13 = arith.extui %12 : i1 to i32
    %c0_i32_10 = arith.constant 0 : i32
    %14 = arith.cmpi ne, %13, %c0_i32_10 : i32
    scf.if %14 {
      %c0_11 = arith.constant 0 : index
      %c0_12 = arith.constant 0 : index
      %c0_13 = arith.constant 0 : index
      %15 = vector.load %arg4[%c0_11, %c0_12, %c0_13] : memref<1x1x300xf32, #tpu.memory_space<vmem>>, vector<1x1x300xf32>
      %16 = vector.shape_cast %15 : vector<1x1x300xf32> to vector<1x300xf32>
      %c0_14 = arith.constant 0 : index
      %c0_15 = arith.constant 0 : index
      %c0_16 = arith.constant 0 : index
      %17 = vector.load %arg5[%c0_14, %c0_15, %c0_16] : memref<1x300x128xbf16, #tpu.memory_space<vmem>>, vector<1x300x128xbf16>
      %18 = vector.shape_cast %17 : vector<1x300x128xbf16> to vector<300x128xbf16>
      %c0_17 = arith.constant 0 : index
      %c0_18 = arith.constant 0 : index
      %c0_19 = arith.constant 0 : index
      %19 = vector.load %arg6[%c0_17, %c0_18, %c0_19] : memref<1x1x128xf32, #tpu.memory_space<vmem>>, vector<1x1x128xf32>
      %20 = vector.shape_cast %19 : vector<1x1x128xf32> to vector<1x128xf32>
      %c0_i32_20 = arith.constant 0 : i32
      %21 = arith.cmpi eq, %arg0, %c0_i32_20 : i32
      %22 = arith.extui %21 : i1 to i32
      %c0_i32_21 = arith.constant 0 : i32
      %23 = arith.cmpi ne, %22, %c0_i32_21 : i32
      scf.if %23 {
        %c0_23 = arith.constant 0 : index
        %c0_24 = arith.constant 0 : index
        %27 = vector.load %arg8[%c0_23, %c0_24] : memref<80x300xf32, #tpu.memory_space<vmem>>, vector<8x300xf32>
        %28 = vector.broadcast %16 : vector<1x300xf32> to vector<8x300xf32>
        %29 = arith.addf %27, %28 : vector<8x300xf32>
        %30 = math.tanh %29 : vector<8x300xf32>
        %31 = vector.shape_cast %30 : vector<8x300xf32> to vector<1x8x300xf32>
        %cst_25 = arith.constant dense<0xFF800000> : vector<1x300xf32>
        %32 = vector.multi_reduction <maximumf>, %31, %cst_25 [1] : vector<1x8x300xf32> to vector<1x300xf32>
        %33 = arith.truncf %32 : vector<1x300xf32> to vector<1x300xbf16>
        %cst_26 = arith.constant dense<0.000000e+00> : vector<1x128xf32>
        %34 = tpu.matmul %33, %18, %cst_26 {dimension_numbers = #tpu.dot_dimension_numbers<[1], [0], [0], [1], [0, 0, 1, 1], [], []>} : vector<1x300xbf16>, vector<300x128xbf16>, vector<1x128xf32> -> vector<1x128xf32>
        %35 = arith.addf %34, %20 : vector<1x128xf32>
        %36 = math.tanh %35 : vector<1x128xf32>
        %cst_27 = arith.constant 0.000000e+00 : f32
        %37 = vector.broadcast %cst_27 : f32 to vector<4x128xf32>
        %38 = tpu.concatenate %36, %37 in 0 : vector<1x128xf32>, vector<4x128xf32> -> vector<5x128xf32>
        %c0_28 = arith.constant 0 : index
        %c0_29 = arith.constant 0 : index
        %c0_30 = arith.constant 0 : index
        %39 = vector.load %arg7[%c0_28, %c0_29, %c0_30] : memref<1x5x128xf32, #tpu.memory_space<vmem>>, vector<1x5x128xf32>
        %40 = vector.shape_cast %39 : vector<1x5x128xf32> to vector<5x128xf32>
        %41 = vector.shape_cast %38 : vector<5x128xf32> to vector<1x5x128xf32>
        tpu.vector_store %arg7[%c0_28, %c0_29, %c0_30], %41 {strides = array<i32>} : memref<1x5x128xf32, #tpu.memory_space<vmem>>, vector<1x5x128xf32>,
      } else {
      }
      %c1_i32 = arith.constant 1 : i32
      %24 = arith.cmpi eq, %arg0, %c1_i32 : i32
      %25 = arith.extui %24 : i1 to i32
      %c0_i32_22 = arith.constant 0 : i32
      %26 = arith.cmpi ne, %25, %c0_i32_22 : i32
      scf.if %26 {
        %c0_23 = arith.constant 0 : index
        %c0_24 = arith.constant 0 : index
        %27 = vector.load %arg8[%c0_23, %c0_24] : memref<80x300xf32, #tpu.memory_space<vmem>>, vector<80x300xf32>
        %28 = vector.broadcast %16 : vector<1x300xf32> to vector<80x300xf32>
        %29 = arith.addf %27, %28 : vector<80x300xf32>
        %30 = math.tanh %29 : vector<80x300xf32>
        %31 = vector.shape_cast %30 : vector<80x300xf32> to vector<5x16x300xf32>
        %cst_25 = arith.constant dense<0xFF800000> : vector<5x300xf32>
        %32 = vector.multi_reduction <maximumf>, %31, %cst_25 [1] : vector<5x16x300xf32> to vector<5x300xf32>
        %33 = arith.truncf %32 : vector<5x300xf32> to vector<5x300xbf16>
        %cst_26 = arith.constant dense<0.000000e+00> : vector<5x128xf32>
        %34 = tpu.matmul %33, %18, %cst_26 {dimension_numbers = #tpu.dot_dimension_numbers<[1], [0], [0], [1], [0, 0, 1, 1], [], []>} : vector<5x300xbf16>, vector<300x128xbf16>, vector<5x128xf32> -> vector<5x128xf32>
        %35 = vector.broadcast %20 : vector<1x128xf32> to vector<5x128xf32>
        %36 = arith.addf %34, %35 : vector<5x128xf32>
        %37 = math.tanh %36 : vector<5x128xf32>
        %c0_27 = arith.constant 0 : index
        %c0_28 = arith.constant 0 : index
        %c0_29 = arith.constant 0 : index
        %38 = vector.load %arg7[%c0_27, %c0_28, %c0_29] : memref<1x5x128xf32, #tpu.memory_space<vmem>>, vector<1x5x128xf32>
        %39 = vector.shape_cast %38 : vector<1x5x128xf32> to vector<5x128xf32>
        %40 = vector.shape_cast %37 : vector<5x128xf32> to vector<1x5x128xf32>
        tpu.vector_store %arg7[%c0_27, %c0_28, %c0_29], %40 {strides = array<i32>} : memref<1x5x128xf32, #tpu.memory_space<vmem>>, vector<1x5x128xf32>,
      } else {
      }
    } else {
    }
    return
  }
  func.func @transform_0(%arg0: i32, %arg1: i32) -> (i32, i32, i32) {
    %c0_i32 = arith.constant 0 : i32
    %c0_i32_0 = arith.constant 0 : i32
    return %arg0, %c0_i32, %arg1 : i32, i32, i32
  }
  func.func @transform_1(%arg0: i32, %arg1: i32) -> (i32, i32, i32) {
    %c0_i32 = arith.constant 0 : i32
    %c0_i32_0 = arith.constant 0 : i32
    return %arg0, %arg1, %c0_i32 : i32, i32, i32
  }
  func.func @transform_2(%arg0: i32, %arg1: i32) -> (i32, i32, i32) {
    %c0_i32 = arith.constant 0 : i32
    %c0_i32_0 = arith.constant 0 : i32
    %c0_i32_1 = arith.constant 0 : i32
    return %arg0, %c0_i32, %c0_i32_0 : i32, i32, i32
  }
  func.func @transform_3(%arg0: i32, %arg1: i32) -> (i32, i32, i32) {
    %c0_i32 = arith.constant 0 : i32
    %c0_i32_0 = arith.constant 0 : i32
    %c0_i32_1 = arith.constant 0 : i32
    return %arg0, %c0_i32, %c0_i32_0 : i32, i32, i32
  }
  func.func @transform_4(%arg0: i32, %arg1: i32) -> (i32, i32, i32) {
    %c0_i32 = arith.constant 0 : i32
    %c0_i32_0 = arith.constant 0 : i32
    %c0_i32_1 = arith.constant 0 : i32
    return %arg0, %c0_i32, %c0_i32_0 : i32, i32, i32
  }
  func.func @transform_5(%arg0: i32, %arg1: i32) -> (i32, i32, i32) {
    %c0_i32 = arith.constant 0 : i32
    %c0_i32_0 = arith.constant 0 : i32
    %c0_i32_1 = arith.constant 0 : i32
    return %arg0, %c0_i32, %c0_i32_0 : i32, i32, i32
  }
}

</mosaic_0001>

<bundles_post_ra>
// kernel: cdssm_forward.1
= control target key start
LH: loop header
LB: loop body
LE: loop exit
PB: predicated region body
PF: predicated region fallthrough
CT: control target
= control target key end

     0   :  { %s2988_s0 = inlined_call_operand.vmem [shape: f32[2,80,768], index: 0, kind: input, shape index: {}]   ;;  %s2989_s1 = inlined_call_operand.vmem [shape: bf16[2,768,300], index: 1, kind: input, shape index: {}]   ;;  %s2990_s2 = inlined_call_operand.vmem [shape: f32[2,1,300], index: 2, kind: input, shape index: {}]   ;;  %s2991_s3 = inlined_call_operand.vmem [shape: bf16[2,300,128], index: 3, kind: input, shape index: {}]   ;;  %s2992_s4 = inlined_call_operand.vmem [shape: f32[2,1,128], index: 4, kind: input, shape index: {}]   ;;  %s2993_s5 = inlined_call_operand.vmem [shape: f32[2,5,128], index: 5, kind: output, shape index: {}]  }
   0x1   :  { %2998 = sst [smem:[#allocation8_spill]] %s2988_s0 }
   0x2   :  { %s2462_s18 = smov 0   ;;  %s2464_s19 = smov 0  }
   0x3   :  { %s2466_s20 = smov 0   ;;  %s2468_s21 = smov 0  }
   0x4   :  { %s2470_s22 = smov 0   ;;  %s2472_s23 = smov 0  }
   0x5   :  { %s2474_s24 = smov 0  }
   0x6 LB: > { %2999 = sst [smem:[#allocation4_spill]] %s2417_s22  ;;  %s24_s25 = sadd.s32 1, %s2417_s22  ;;  %s2425_s24 = sphi %s2474_s24, %s15_s24   ;;  %s2421_s23 = sphi %s2472_s23, %s3008_s23   ;;  %s2417_s22 = sphi %s2470_s22, %s3007_s22   ;;  %s2413_s21 = sphi %s2468_s21, %s3006_s21   ;;  %s2409_s20 = sphi %s2466_s20, %s3005_s20   ;;  %s2405_s19 = sphi %s2464_s19, %s3010_s19   ;;  %s2401_s18 = sphi %s2462_s18, %s3009_s18  }
   0x7   : > { %3000 = sst [smem:[#allocation5_spill]] %s2421_s23  ;;  %p25_p0 = scmp.ge.s32.totalorder %s24_s25, 3 }
   0x8   : > { %s27_s26 = sadd.s32 1, %s2421_s23  ;;  %p43_p1 = scmp.ne.s32.totalorder %s2405_s19, %s2401_s18 }
   0x9   : > { %p44_p2 = scmp.eq.s32.totalorder %s2425_s24, 0  ;;  %s3012_s25 = smov (%p25_p0, %s24_s25), 0 }
   0xa   : > { %3001 = sst [smem:[#allocation6_spill]] %s3012_s25  ;;  %s3014_s26 = smov (!%p25_p0, %s27_s26), %s2421_s23 }
   0xb   : > { %p45_p3 = por %p44_p2, %p43_p1  ;;  %p29_p4 = scmp.ge.s32.totalorder %s3014_s26, 2 }
   0xc   : > { %s32_s27 = ssub.s32 %s2417_s22, %s3012_s25  ;;  %s36_s30 = sadd.s32 1, %s2405_s19 }
   0xd   : > { %s3016_s26 = smov (%p29_p4, %s3014_s26), 0  ;;  %p1949_p6 = scmp.ge.s32.totalorder %s2425_s24, 6 }
   0xe   : > { %3002 = sst [smem:[#allocation7_spill]] %s3016_s26  ;;  %s31_s28 = ssub.s32 %s2421_s23, %s3016_s26 }
   0xf   : > { %s33_s29 = sor.u32 %s32_s27, %s31_s28  ;;  %201 = sbr.rel (%p1949_p6) target bundleno = 40 (0x28), region = 16 }
  0x10   : > { %p34_p5 = scmp.eq.s32.totalorder %s33_s29, 0 }
  0x12   : > { %s2513_s6 = scalar_select %p34_p5, %s2405_s19, %s36_s30  }
  0x14   : > { %204 = sbr.rel (!%p45_p3) target bundleno = 40 (0x28), region = 20  ;;  %s206_s7 = sand.u32 (%p45_p3), 1, %s2405_s19  }
  0x15   : > { %s2169_s8 = smul.u32 (%p45_p3), 160, %s206_s7  ;;  %s1950_s9 = sshll.u32 (%p45_p3), %s2417_s22, 1 }
  0x16   : > { %s2170_s10 = smul.u32 (%p45_p3), 60, %s2421_s23  ;;  %s3003_s0 = sld [smem:[#allocation8_spill]] (%p45_p3) }
  0x17   : > { %s2527_s16 = scalar_lea.vmem (%p45_p3), [#allocation3], %s2169_s8 }
  0x18   : > { %s211_s11 = sadd.s32 (%p45_p3), %s2170_s10, %s1950_s9 }
  0x19   : > { %s1951_s12 = sshll.u32 %s211_s11, 3 }
  0x1c   : > { %s2522_s15 = scalar_lea.vmem %s3003_s0, %s1951_s12 }
  0x1d   : > { %v226_v0 = vld [vmem:[%s2522_s15] sm:$0xff]  ;;  %v228_v1 = vld [vmem:[%s2522_s15 + $0x8] sm:$0xff]  ;;  %v230_v2 = vld [vmem:[%s2522_s15 + $0x30] sm:$0xff] }
  0x1e   : > { %227 = vst [vmem:[%s2527_s16] sm:$0xff] %v226_v0  ;;  %229 = vst [vmem:[%s2527_s16 + $0x8] sm:$0xff] %v228_v1  ;;  %v232_v3 = vld [vmem:[%s2522_s15 + $0x38] sm:$0xff]  ;;  %v234_v4 = vld [vmem:[%s2522_s15 + $0x60] sm:$0xff] }
  0x1f   : > { %231 = vst [vmem:[%s2527_s16 + $0x10] sm:$0xff] %v230_v2  ;;  %v236_v5 = vld [vmem:[%s2522_s15 + $0x68] sm:$0xff]  ;;  %233 = vst [vmem:[%s2527_s16 + $0x18] sm:$0xff] %v232_v3  ;;  %v238_v6 = vld [vmem:[%s2522_s15 + $0x90] sm:$0xff] }
  0x20   : > { %235 = vst [vmem:[%s2527_s16 + $0x20] sm:$0xff] %v234_v4  ;;  %237 = vst [vmem:[%s2527_s16 + $0x28] sm:$0xff] %v236_v5  ;;  %v240_v7 = vld [vmem:[%s2522_s15 + $0x98] sm:$0xff]  ;;  %v242_v8 = vld [vmem:[%s2522_s15 + $0xc0] sm:$0xff] }
  0x21   : > { %239 = vst [vmem:[%s2527_s16 + $0x30] sm:$0xff] %v238_v6  ;;  %241 = vst [vmem:[%s2527_s16 + $0x38] sm:$0xff] %v240_v7  ;;  %v244_v9 = vld [vmem:[%s2522_s15 + $0xc8] sm:$0xff]  ;;  %v246_v10 = vld [vmem:[%s2522_s15 + $0xf0] sm:$0xff] }
  0x22   : > { %243 = vst [vmem:[%s2527_s16 + $0x40] sm:$0xff] %v242_v8  ;;  %v248_v11 = vld [vmem:[%s2522_s15 + $0xf8] sm:$0xff]  ;;  %245 = vst [vmem:[%s2527_s16 + $0x48] sm:$0xff] %v244_v9  ;;  %v250_v12 = vld [vmem:[%s2522_s15 + $0x120] sm:$0xff] }
  0x23   : > { %247 = vst [vmem:[%s2527_s16 + $0x50] sm:$0xff] %v246_v10  ;;  %249 = vst [vmem:[%s2527_s16 + $0x58] sm:$0xff] %v248_v11  ;;  %v252_v13 = vld [vmem:[%s2522_s15 + $0x128] sm:$0xff]  ;;  %v254_v14 = vld [vmem:[%s2522_s15 + $0x150] sm:$0xff] }
  0x24   : > { %251 = vst [vmem:[%s2527_s16 + $0x60] sm:$0xff] %v250_v12  ;;  %253 = vst [vmem:[%s2527_s16 + $0x68] sm:$0xff] %v252_v13  ;;  %v256_v15 = vld [vmem:[%s2522_s15 + $0x158] sm:$0xff]  ;;  %v258_v16 = vld [vmem:[%s2522_s15 + $0x180] sm:$0xff] }
  0x25   : > { %255 = vst [vmem:[%s2527_s16 + $0x70] sm:$0xff] %v254_v14  ;;  %v260_v17 = vld [vmem:[%s2522_s15 + $0x188] sm:$0xff]  ;;  %257 = vst [vmem:[%s2527_s16 + $0x78] sm:$0xff] %v256_v15  ;;  %v262_v18 = vld [vmem:[%s2522_s15 + $0x1b0] sm:$0xff] }
  0x26   : > { %259 = vst [vmem:[%s2527_s16 + $0x80] sm:$0xff] %v258_v16  ;;  %261 = vst [vmem:[%s2527_s16 + $0x88] sm:$0xff] %v260_v17  ;;  %v264_v19 = vld [vmem:[%s2522_s15 + $0x1b8] sm:$0xff] }
  0x27   : > { %263 = vst [vmem:[%s2527_s16 + $0x90] sm:$0xff] %v262_v18  ;;  %265 = vst [vmem:[%s2527_s16 + $0x98] sm:$0xff] %v264_v19 }
  0x28 PF: > { %p1952_p7 = scmp.ge.s32.totalorder %s2425_s24, 1  ;;  %p305_p8 = scmp.lt.s32.totalorder %s2425_s24, 7 }
  0x2a   : > { %p306_p9 = pnand %p1952_p7, %p305_p8 }
  0x2b   : > { %s312_s17 = sand.u32 (!%p306_p9), 1, %s2401_s18   ;;  %s1953_s27 = sshll.u32 (!%p306_p9), %s2409_s20, 5 }
  0x2c   : > { %309 = sbr.rel (%p306_p9) target bundleno = 963 (0x3c3), region = 59  ;;  %p362_p10 = scmp.lt.s32.totalorder (!%p306_p9), %s2413_s21, 1 }
  0x2d   : > { %s2171_s28 = smul.u32 (!%p306_p9), 160, %s312_s17  ;;  %p364_p11 = scmp.lt.s32.totalorder (!%p306_p9), %s1953_s27, 95 }
  0x2e   : > { %p1957_p12 = scmp.ne.s32.totalorder (!%p306_p9), %s2409_s20, 0 }
  0x31   : > { %s2572_s29 = scalar_select %p362_p10, %s2413_s21, 1 }
  0x32   : > { %s3018_s27 = smov (!%p364_p11, %s1953_s27), 95 }
  0x33   : > { %s2173_s30 = smul.u32 288, %s2572_s29  ;;  %s1956_s11 = sshll.u32 %s2572_s29, 3 }
  0x34   : > { %s2172_s10 = smul.u32 3, %s3018_s27  ;;  %s2584_s14 = scalar_lea.vmem %s2993_s5, %s1956_s11 }
  0x35   : > { %s2174_s18 = smul.u32 3, %s2572_s29  ;;  %s2602_s11 = scalar_lea.vmem [#allocation3], %s2171_s28 }
  0x36   : > { %s368_s15 = sadd.s32 %s2173_s30, %s2172_s10  ;;  %s2175_s16 = smul.u32 152, %s2572_s29 }
  0x37   : > { %s1954_s17 = sshll.u32 %s368_s15, 2  ;;  %s2590_s25 = scalar_lea.vmem %s2990_s2, %s2174_s18 }
  0x38   : > { %s2595_s7 = scalar_lea.vmem %s2989_s1, %s1954_s17  ;;  %s2600_s9 = scalar_lea.vmem %s2991_s3, %s2175_s16 }
  0x39   : > { %392 = sbr.rel (%p1957_p12) target bundleno = 78 (0x4e), region = 67 }
  0x3e   : > { %vm395_vm0 = vcmask 359424   ;;  %v2427_v20 = vmov 0.0  }
  0x3f   : > { %393 = vst [vmem:[#allocation2] sm:$0xff] %v2427_v20  ;;  %394 = vst [vmem:[#allocation2 + $0x8] sm:$0xff] %v2427_v20 }
  0x40   : > { %397 = vst [vmem:[#allocation2 + $0x18] sm:$0xff] %v2427_v20  ;;  %398 = vst [vmem:[#allocation2 + $0x20] sm:$0xff] %v2427_v20 }
  0x41   : > { %400 = vst [vmem:[#allocation2 + $0x30] sm:$0xff] %v2427_v20  ;;  %401 = vst [vmem:[#allocation2 + $0x38] sm:$0xff] %v2427_v20 }
  0x42   : > { %403 = vst [vmem:[#allocation2 + $0x48] sm:$0xff] %v2427_v20  ;;  %404 = vst [vmem:[#allocation2 + $0x50] sm:$0xff] %v2427_v20 }
  0x43   : > { %406 = vst [vmem:[#allocation2 + $0x60] sm:$0xff] %v2427_v20  ;;  %407 = vst [vmem:[#allocation2 + $0x68] sm:$0xff] %v2427_v20 }
  0x44   : > { %409 = vst [vmem:[#allocation2 + $0x78] sm:$0xff] %v2427_v20  ;;  %410 = vst [vmem:[#allocation2 + $0x80] sm:$0xff] %v2427_v20 }
  0x45   : > { %412 = vst [vmem:[#allocation2 + $0x90] sm:$0xff] %v2427_v20  ;;  %413 = vst [vmem:[#allocation2 + $0x98] sm:$0xff] %v2427_v20 }
  0x46   : > { %415 = vst [vmem:[#allocation2 + $0xa8] sm:$0xff] %v2427_v20  ;;  %416 = vst [vmem:[#allocation2 + $0xb0] sm:$0xff] %v2427_v20 }
  0x47   : > { %418 = vst [vmem:[#allocation2 + $0xc0] sm:$0xff] %v2427_v20  ;;  %419 = vst [vmem:[#allocation2 + $0xc8] sm:$0xff] %v2427_v20 }
  0x48   : > { %421 = vst [vmem:[#allocation2 + $0xd8] sm:$0xff] %v2427_v20  ;;  %422 = vst [vmem:[#allocation2 + $0xe0] sm:$0xff] %v2427_v20 }
  0x49   : > { %396 = vst.msk [vmem:[#allocation2 + $0x10] sm:$0xff] %vm395_vm0, %v2427_v20  ;;  %399 = vst.msk [vmem:[#allocation2 + $0x28] sm:$0xff] %vm395_vm0, %v2427_v20 }
  0x4a   : > { %402 = vst.msk [vmem:[#allocation2 + $0x40] sm:$0xff] %vm395_vm0, %v2427_v20  ;;  %405 = vst.msk [vmem:[#allocation2 + $0x58] sm:$0xff] %vm395_vm0, %v2427_v20 }
  0x4b   : > { %408 = vst.msk [vmem:[#allocation2 + $0x70] sm:$0xff] %vm395_vm0, %v2427_v20  ;;  %411 = vst.msk [vmem:[#allocation2 + $0x88] sm:$0xff] %vm395_vm0, %v2427_v20 }
  0x4c   : > { %414 = vst.msk [vmem:[#allocation2 + $0xa0] sm:$0xff] %vm395_vm0, %v2427_v20  ;;  %417 = vst.msk [vmem:[#allocation2 + $0xb8] sm:$0xff] %vm395_vm0, %v2427_v20 }
  0x4d   : > { %420 = vst.msk [vmem:[#allocation2 + $0xd0] sm:$0xff] %vm395_vm0, %v2427_v20  ;;  %423 = vst.msk [vmem:[#allocation2 + $0xe8] sm:$0xff] %vm395_vm0, %v2427_v20 }
  0x4e PF: > { %v2237_v21 = vld [vmem:[%s2595_s7 + $0xac] ss:$12 sps:$4 sm:$0xff]   ;;  %v2239_v22 = vld [vmem:[%s2595_s7 + $0xa8] ss:$12 sps:$4 sm:$0xff]   ;;  %v2242_v24 = vld [vmem:[%s2595_s7 + $0x90] ss:$12 sps:$4 sm:$0xff]  }
  0x4f   : > { %804 = vmatprep.subr.bf16.mxu0 %v2237_v21  ;;  %v2240_v23 = vld [vmem:[%s2595_s7 + $0x94] ss:$12 sps:$4 sm:$0xff]   ;;  %v2243_v25 = vld [vmem:[%s2595_s7 + $0x7c] ss:$12 sps:$4 sm:$0xff]   ;;  %v2245_v26 = vld [vmem:[%s2595_s7 + $0x78] ss:$12 sps:$4 sm:$0xff]  }
  0x50   : > { %805 = vmatpush1.bf16.msra.mxu0 %v2239_v22  ;;  %v2246_v27 = vld [vmem:[%s2595_s7 + $0x64] ss:$12 sps:$4 sm:$0xff]   ;;  %v2248_v29 = vld [vmem:[%s2595_s7 + $0x60] ss:$12 sps:$4 sm:$0xff]   ;;  %v2251_v34 = vld [vmem:[%s2595_s7 + $0x48] ss:$12 sps:$4 sm:$0xff]  }
  0x51   : > { %806 = vmatprep.subr.bf16.mxu0 %v2240_v23  ;;  %v2257_v28 = vld [vmem:[%s2595_s7 + $0x170] ss:$12 sps:$4 sm:$0xff]   ;;  %v2249_v31 = vld [vmem:[%s2595_s7 + $0x4c] ss:$12 sps:$4 sm:$0xff]   ;;  %v2252_v35 = vld [vmem:[%s2595_s7 + $0x34] ss:$12 sps:$4 sm:$0xff]  }
  0x52   : > { %2051 = vmatprep.subr.bf16.mxu1 %v2257_v28  ;;  %v2259_v30 = vld [vmem:[%s2595_s7 + $0xb0] ss:$12 sps:$4 sm:$0xff]   ;;  %v2262_v32 = vld [vmem:[%s2595_s7 + $0x158] ss:$12 sps:$4 sm:$0xff]   ;;  %v2267_v36 = vld [vmem:[%s2595_s7 + $0x140] ss:$12 sps:$4 sm:$0xff]  }
  0x53   : > { %2052 = vmatpush3.bf16.msra.mxu1 %v2259_v30  ;;  %v2264_v33 = vld [vmem:[%s2595_s7 + $0x98] ss:$12 sps:$4 sm:$0xff]   ;;  %v2269_v37 = vld [vmem:[%s2595_s7 + $0x80] ss:$12 sps:$4 sm:$0xff]   ;;  %v2254_v38 = vld [vmem:[%s2595_s7 + $0x30] ss:$12 sps:$4 sm:$0xff]  }
  0x54   : > { %807 = vmatpush1.bf16.msra.mxu0 %v2242_v24  ;;  %2053 = vmatprep.subr.bf16.mxu1 %v2262_v32  ;;  %v2272_v39 = vld [vmem:[%s2595_s7 + $0x128] ss:$12 sps:$4 sm:$0xff]   ;;  %v2258_v42 = vld [vmem:[%s2595_s7 + $0x18] ss:$12 sps:$4 sm:$0xff]   ;;  %v2277_v43 = vld [vmem:[%s2595_s7 + $0x110] ss:$12 sps:$4 sm:$0xff]  }
  0x55   : > { %808 = vmatprep.subr.bf16.mxu0 %v2243_v25  ;;  %v2255_v40 = vld [vmem:[%s2595_s7 + $0x1c] ss:$12 sps:$4 sm:$0xff]   ;;  %v2260_v44 = vld [vmem:[%s2595_s7 + $0x4] ss:$12 sps:$4 sm:$0xff]   ;;  %v2263_v47 = vld [vmem:[%s2595_s7] ss:$12 sps:$4 sm:$0xff]  }
  0x56   : > { %v2274_v41 = vld [vmem:[%s2595_s7 + $0x68] ss:$12 sps:$4 sm:$0xff]   ;;  %v2279_v45 = vld [vmem:[%s2595_s7 + $0x50] ss:$12 sps:$4 sm:$0xff]   ;;  %v2282_v46 = vld [vmem:[%s2595_s7 + $0xf8] ss:$12 sps:$4 sm:$0xff]  }
  0x57   : > { %2054 = vmatpush3.bf16.msra.mxu1 %v2264_v33  ;;  %v2265_v48 = vld [vmem:[%s2595_s7 + $0x16c] ss:$12 sps:$4 sm:$0xff]   ;;  %v2268_v51 = vld [vmem:[%s2595_s7 + $0x168] ss:$12 sps:$4 sm:$0xff]   ;;  %v2273_v53 = vld [vmem:[%s2595_s7 + $0x150] ss:$12 sps:$4 sm:$0xff]  }
  0x58   : > { %809 = vmatpush1.bf16.msra.mxu0 %v2245_v26  ;;  %2055 = vmatprep.subr.bf16.mxu1 %v2267_v36  ;;  %v2284_v49 = vld [vmem:[%s2595_s7 + $0x38] ss:$12 sps:$4 sm:$0xff]   ;;  %v2287_v50 = vld [vmem:[%s2595_s7 + $0xe0] ss:$12 sps:$4 sm:$0xff]   ;;  %v2292_v55 = vld [vmem:[%s2595_s7 + $0xc8] ss:$12 sps:$4 sm:$0xff]  }
  0x59   : > { %810 = vmatprep.subr.bf16.mxu0 %v2246_v27  ;;  %v2270_v52 = vld [vmem:[%s2595_s7 + $0x154] ss:$12 sps:$4 sm:$0xff]   ;;  %v455_v56 = vld [vmem:[%s2602_s11 + $0x8] sm:$0xff]  ;;  %v457_v57 = vld [vmem:[%s2602_s11 + $0x18] sm:$0xff]  ;;  %vm992_vm1 = vcmask 359424   ;;  %p2006_p13 = scmp.ne.s32.totalorder %s2409_s20, 2 }
  0x5a   : > { %v2289_v54 = vld [vmem:[%s2595_s7 + $0x20] ss:$12 sps:$4 sm:$0xff]   ;;  %v2275_v58 = vld [vmem:[%s2595_s7 + $0x13c] ss:$12 sps:$4 sm:$0xff]   ;;  %v475_v60 = vpack.c.bf16 %v457_v57, %v455_v56  ;;  %v454_v61 = vld [vmem:[%s2602_s11] sm:$0xff]  ;;  %s3004_s22 = scalar_lea.vmem (!%p2006_p13), %s2992_s4, %s2572_s29  ;;  %p2007_p0 = scmp.ne.s32.totalorder (!%p2006_p13), %s2413_s21, 0 }
  0x5b   : > { %2056 = vmatpush3.bf16.msra.mxu1 %v2269_v37  ;;  %v2294_v59 = vld [vmem:[%s2595_s7 + $0x8] ss:$12 sps:$4 sm:$0xff]   ;;  %v456_v62 = vld [vmem:[%s2602_s11 + $0x10] sm:$0xff]  ;;  %v459_v63 = vld [vmem:[%s2602_s11 + $0x28] sm:$0xff] }
  0x5c   : > { %811 = vmatpush1.bf16.msra.mxu0 %v2248_v29  ;;  %2057 = vmatprep.subr.bf16.mxu1 %v2272_v39  ;;  %v2278_v0 = vld [vmem:[%s2595_s7 + $0x138] ss:$12 sps:$4 sm:$0xff]   ;;  %v461_v1 = vld [vmem:[%s2602_s11 + $0x38] sm:$0xff]  ;;  %v474_v3 = vpack.c.bf16 %v456_v62, %v454_v61  ;;  %v458_v7 = vld [vmem:[%s2602_s11 + $0x20] sm:$0xff] }
  0x5d   : > { %812 = vmatprep.subr.bf16.mxu0 %v2249_v31  ;;  %919 = vmatprep.mubr.bf16.mxu1 %v475_v60  ;;  %v2280_v2 = vld [vmem:[%s2595_s7 + $0x124] ss:$12 sps:$4 sm:$0xff]   ;;  %v477_v4 = vpack.c.bf16 %v461_v1, %v459_v63  ;;  %v2283_v5 = vld [vmem:[%s2595_s7 + $0x120] ss:$12 sps:$4 sm:$0xff]   ;;  %v463_v9 = vld [vmem:[%s2602_s11 + $0x48] sm:$0xff] }
  0x5e   : > { %836 = vmatprep.mubr.bf16.mxu0 %v475_v60  ;;  %v2285_v6 = vld [vmem:[%s2595_s7 + $0x10c] ss:$12 sps:$4 sm:$0xff]   ;;  %v460_v8 = vld [vmem:[%s2602_s11 + $0x30] sm:$0xff]  ;;  %v2288_v11 = vld [vmem:[%s2595_s7 + $0x108] ss:$12 sps:$4 sm:$0xff]  }
  0x5f   : > { %2058 = vmatpush3.bf16.msra.mxu1 %v2274_v41  ;;  %v465_v10 = vld [vmem:[%s2602_s11 + $0x58] sm:$0xff]  ;;  %v2290_v12 = vld [vmem:[%s2595_s7 + $0xf4] ss:$12 sps:$4 sm:$0xff]   ;;  %v476_v13 = vpack.c.bf16 %v460_v8, %v458_v7  ;;  %v2293_v15 = vld [vmem:[%s2595_s7 + $0xf0] ss:$12 sps:$4 sm:$0xff]  }
  0x60   : > { %813 = vmatpush1.bf16.msra.mxu0 %v2251_v34  ;;  %2059 = vmatprep.subr.bf16.mxu1 %v2277_v43  ;;  %v479_v14 = vpack.c.bf16 %v465_v10, %v463_v9  ;;  %v2295_v16 = vld [vmem:[%s2595_s7 + $0xdc] ss:$12 sps:$4 sm:$0xff]   ;;  %v462_v17 = vld [vmem:[%s2602_s11 + $0x40] sm:$0xff]  ;;  %v464_v18 = vld [vmem:[%s2602_s11 + $0x50] sm:$0xff] }
  0x61   : > { %814 = vmatprep.subr.bf16.mxu0 %v2252_v35  ;;  %v467_v19 = vld [vmem:[%s2602_s11 + $0x68] sm:$0xff]  ;;  %v469_v20 = vld [vmem:[%s2602_s11 + $0x78] sm:$0xff]  ;;  %v2298_v22 = vld [vmem:[%s2595_s7 + $0xc4] ss:$12 sps:$4 sm:$0xff]   ;;  %v478_v23 = vpack.c.bf16 %v464_v18, %v462_v17 }
  0x62   : > { %v2297_v21 = vld [vmem:[%s2595_s7 + $0xd8] ss:$12 sps:$4 sm:$0xff]   ;;  %v481_v24 = vpack.c.bf16 %v469_v20, %v467_v19  ;;  %v2300_v25 = vld [vmem:[%s2595_s7 + $0xc0] ss:$12 sps:$4 sm:$0xff]   ;;  %v466_v26 = vld [vmem:[%s2602_s11 + $0x60] sm:$0xff] }
  0x63   : > { %2060 = vmatpush3.bf16.msra.mxu1 %v2279_v45  ;;  %v468_v27 = vld [vmem:[%s2602_s11 + $0x70] sm:$0xff]  ;;  %v471_v28 = vld [vmem:[%s2602_s11 + $0x88] sm:$0xff]  ;;  %v473_v29 = vld [vmem:[%s2602_s11 + $0x98] sm:$0xff] }
  0x64   : > { %815 = vmatpush1.bf16.msra.mxu0 %v2254_v38  ;;  %2061 = vmatprep.subr.bf16.mxu1 %v2282_v46  ;;  %v480_v30 = vpack.c.bf16 %v468_v27, %v466_v26  ;;  %v483_v31 = vpack.c.bf16 %v473_v29, %v471_v28  ;;  %v470_v32 = vld [vmem:[%s2602_s11 + $0x80] sm:$0xff]  ;;  %v472_v33 = vld [vmem:[%s2602_s11 + $0x90] sm:$0xff]  ;;  %v429_v41 = vld [vmem:[#allocation2 + $0x28] sm:$0xff] }
  0x65   : > { %816 = vmatprep.subr.bf16.mxu0 %v2255_v40  ;;  %v482_v34 = vpack.c.bf16 %v472_v33, %v470_v32  ;;  %v426_v36 = vld [vmem:[#allocation2 + $0x10] sm:$0xff]  ;;  %v432_v46 = vld [vmem:[#allocation2 + $0x40] sm:$0xff]  ;;  %v425_v63 = vld [vmem:[#allocation2 + $0x8] sm:$0xff] }
  0x66   : > { %v438_v56 = vld [vmem:[#allocation2 + $0x70] sm:$0xff]  ;;  %v428_v10 = vld [vmem:[#allocation2 + $0x20] sm:$0xff]  ;;  %v433_v27 = vld [vmem:[#allocation2 + $0x48] sm:$0xff] }
  0x67   : > { %2062 = vmatpush3.bf16.msra.mxu1 %v2284_v49  ;;  %v434_v32 = vld [vmem:[#allocation2 + $0x50] sm:$0xff] }
  0x68   : > { %817 = vmatpush1.bf16.msra.mxu0 %v2258_v42  ;;  %2063 = vmatprep.subr.bf16.mxu1 %v2287_v50  ;;  %v450_v33 = vld [vmem:[#allocation2 + $0xd0] sm:$0xff] }
  0x69   : > { %818 = vmatprep.subr.bf16.mxu0 %v2260_v44 }
  0x6b   : > { %2064 = vmatpush3.bf16.msra.mxu1 %v2289_v54 }
  0x6c   : > { %819 = vmatpush1.bf16.msra.mxu0 %v2263_v47  ;;  %2065 = vmatprep.subr.bf16.mxu1 %v2292_v55 }
  0x6d   : > { %820 = vmatprep.subr.bf16.mxu0 %v2265_v48 }
  0x6f   : > { %2066 = vmatpush3.bf16.msra.mxu1 %v2294_v59  ;;  %v424_v59 = vld [vmem:[#allocation2] sm:$0xff] }
  0x70   : > { %821 = vmatpush2.bf16.msra.mxu0 %v2268_v51  ;;  %v435_v51 = vld [vmem:[#allocation2 + $0x58] sm:$0xff] }
  0x71   : > { %822 = vmatprep.subr.bf16.mxu0 %v2270_v52 }
  0x72   : > { %920 = vmatmul.mubr.bf16.vlgmr.msra.gmra.mxu1 %v474_v3 }
  0x73   : > { %927 = vmatprep.mubr.bf16.mxu1 %v477_v4 }
  0x74   : > { %823 = vmatpush2.bf16.msra.mxu0 %v2273_v53 }
  0x75   : > { %824 = vmatprep.subr.bf16.mxu0 %v2275_v58 }
  0x78   : > { %825 = vmatpush2.bf16.msra.mxu0 %v2278_v0  ;;  %v441_v0 = vld [vmem:[#allocation2 + $0x88] sm:$0xff] }
  0x79   : > { %826 = vmatprep.subr.bf16.mxu0 %v2280_v2 }
  0x7a   : > { %928 = vmatmul.mubr.bf16.gmra.mxu1 %v476_v13 }
  0x7b   : > { %935 = vmatprep.mubr.bf16.mxu1 %v479_v14 }
  0x7c   : > { %827 = vmatpush2.bf16.msra.mxu0 %v2283_v5  ;;  %v427_v5 = vld [vmem:[#allocation2 + $0x18] sm:$0xff] }
  0x7d   : > { %828 = vmatprep.subr.bf16.mxu0 %v2285_v6 }
  0x80   : > { %829 = vmatpush2.bf16.msra.mxu0 %v2288_v11  ;;  %v444_v11 = vld [vmem:[#allocation2 + $0xa0] sm:$0xff] }
  0x81   : > { %830 = vmatprep.subr.bf16.mxu0 %v2290_v12 }
  0x82   : > { %936 = vmatmul.mubr.bf16.gmra.mxu1 %v478_v23 }
  0x83   : > { %943 = vmatprep.mubr.bf16.mxu1 %v481_v24 }
  0x84   : > { %831 = vmatpush2.bf16.msra.mxu0 %v2293_v15 }
  0x85   : > { %832 = vmatprep.subr.bf16.mxu0 %v2295_v16  ;;  %v430_v16 = vld [vmem:[#allocation2 + $0x30] sm:$0xff] }
  0x88   : > { %833 = vmatpush2.bf16.msra.mxu0 %v2297_v21  ;;  %v431_v21 = vld [vmem:[#allocation2 + $0x38] sm:$0xff] }
  0x89   : > { %834 = vmatprep.subr.bf16.mxu0 %v2298_v22  ;;  %v447_v22 = vld [vmem:[#allocation2 + $0xb8] sm:$0xff] }
  0x8a   : > { %944 = vmatmul.mubr.bf16.gmra.mxu1 %v480_v30 }
  0x8b   : > { %951 = vmatprep.mubr.bf16.mxu1 %v483_v31 }
  0x8c   : > { %835 = vmatpush2.bf16.msra.mxu0 %v2300_v25 }
  0x8f   : > { %837 = vmatmul.mubr.bf16.vlgmr.msra.gmra.mxu0 %v474_v3 }
  0x90   : > { %846 = vmatprep.mubr.bf16.mxu0 %v477_v4 }
  0x92   : > { %952 = vmatmul.mubr.bf16.gmra.mxu1 %v482_v34 }
  0x97   : > { %847 = vmatmul.mubr.bf16.gmra.mxu0 %v476_v13 }
  0x98   : > { %856 = vmatprep.mubr.bf16.mxu0 %v479_v14 }
  0x9f   : > { %857 = vmatmul.mubr.bf16.gmra.mxu0 %v478_v23 }
  0xa0   : > { %866 = vmatprep.mubr.bf16.mxu0 %v481_v24 }
  0xa7   : > { %867 = vmatmul.mubr.bf16.gmra.mxu0 %v480_v30 }
  0xa8   : > { %876 = vmatprep.mubr.bf16.mxu0 %v483_v31 }
  0xaf   : > { %877 = vmatmul.mubr.bf16.gmra.mxu0 %v482_v34 }
 0x132   : > { %v2067_v35 = vpop.f32.mrf.mxu1 }
 0x134   : > { %v2068_v37 = vpop.f32.mrf.mxu1 }
 0x135   : > { %v2069_v38 = vadd.f32 %v2068_v37, %v2067_v35 }
 0x136   : > { %v2070_v39 = vpop.f32.mrf.mxu1 }
 0x137   : > { %v962_v40 = vadd.f32 %v2069_v38, %v426_v36  ;;  %v436_v38 = vld [vmem:[#allocation2 + $0x60] sm:$0xff] }
 0x138   : > { %v2071_v42 = vpop.f32.mrf.mxu1 }
 0x139   : > { %993 = vst.msk [vmem:[#allocation2 + $0x10] sm:$0xff] %vm992_vm1, %v962_v40  ;;  %v2072_v43 = vadd.f32 %v2071_v42, %v2070_v39 }
 0x13a   : > { %v2073_v44 = vpop.f32.mrf.mxu1 }
 0x13b   : > { %v965_v45 = vadd.f32 %v2072_v43, %v429_v41  ;;  %v437_v43 = vld [vmem:[#allocation2 + $0x68] sm:$0xff] }
 0x13c   : > { %v2074_v47 = vpop.f32.mrf.mxu1 }
 0x13d   : > { %996 = vst.msk [vmem:[#allocation2 + $0x28] sm:$0xff] %vm992_vm1, %v965_v45  ;;  %v2075_v48 = vadd.f32 %v2074_v47, %v2073_v44  ;;  %v453_v44 = vld [vmem:[#allocation2 + $0xe8] sm:$0xff] }
 0x13e   : > { %v2076_v49 = vpop.f32.mrf.mxu1 }
 0x13f   : > { %v968_v50 = vadd.f32 %v2075_v48, %v432_v46 }
 0x140   : > { %v2077_v52 = vpop.f32.mrf.mxu1 }
 0x141   : > { %999 = vst.msk [vmem:[#allocation2 + $0x40] sm:$0xff] %vm992_vm1, %v968_v50  ;;  %v2078_v53 = vadd.f32 %v2077_v52, %v2076_v49  ;;  %v439_v49 = vld [vmem:[#allocation2 + $0x78] sm:$0xff] }
 0x142   : > { %v2079_v54 = vpop.f32.mrf.mxu1 }
 0x143   : > { %v971_v55 = vadd.f32 %v2078_v53, %v435_v51  ;;  %v440_v53 = vld [vmem:[#allocation2 + $0x80] sm:$0xff] }
 0x144   : > { %v2080_v57 = vpop.f32.mrf.mxu1 }
 0x145   : > { %1002 = vst.msk [vmem:[#allocation2 + $0x58] sm:$0xff] %vm992_vm1, %v971_v55  ;;  %v2081_v58 = vadd.f32 %v2080_v57, %v2079_v54 }
 0x146   : > { %v2082_v60 = vpop.f32.mrf.mxu1 }
 0x147   : > { %v974_v61 = vadd.f32 %v2081_v58, %v438_v56  ;;  %v442_v56 = vld [vmem:[#allocation2 + $0x90] sm:$0xff] }
 0x148   : > { %v2083_v1 = vpop.f32.mrf.mxu1 }
 0x149   : > { %1005 = vst.msk [vmem:[#allocation2 + $0x70] sm:$0xff] %vm992_vm1, %v974_v61  ;;  %v2084_v3 = vadd.f32 %v2083_v1, %v2082_v60  ;;  %v446_v1 = vld [vmem:[#allocation2 + $0xb0] sm:$0xff] }
 0x14a   : > { %v2085_v6 = vpop.f32.mrf.mxu1 }
 0x14b   : > { %v977_v8 = vadd.f32 %v2084_v3, %v441_v0 }
 0x14c   : > { %v2086_v12 = vpop.f32.mrf.mxu1 }
 0x14d   : > { %1008 = vst.msk [vmem:[#allocation2 + $0x88] sm:$0xff] %vm992_vm1, %v977_v8  ;;  %v2087_v14 = vadd.f32 %v2086_v12, %v2085_v6 }
 0x14e   : > { %v2088_v17 = vpop.f32.mrf.mxu1 }
 0x14f   : > { %v838_v62 = vpop.f32.mrf.mxu0  ;;  %v980_v19 = vadd.f32 %v2087_v14, %v444_v11 }
 0x150   : > { %v960_v2 = vadd.f32 %v838_v62, %v424_v59  ;;  %v2089_v23 = vpop.f32.mrf.mxu1  ;;  %v443_v59 = vld [vmem:[#allocation2 + $0x98] sm:$0xff]  ;;  %v445_v62 = vld [vmem:[#allocation2 + $0xa8] sm:$0xff] }
 0x151   : > { %v840_v4 = vpop.f32.mrf.mxu0  ;;  %1011 = vst.msk [vmem:[#allocation2 + $0xa0] sm:$0xff] %vm992_vm1, %v980_v19  ;;  %v2090_v25 = vadd.f32 %v2089_v23, %v2088_v17 }
 0x152   : > { %990 = vst [vmem:[#allocation2] sm:$0xff] %v960_v2  ;;  %v961_v7 = vadd.f32 %v840_v4, %v425_v63  ;;  %v2091_v28 = vpop.f32.mrf.mxu1  ;;  %v448_v4 = vld [vmem:[#allocation2 + $0xc0] sm:$0xff] }
 0x153   : > { %v842_v9 = vpop.f32.mrf.mxu0  ;;  %v983_v30 = vadd.f32 %v2090_v25, %v447_v22 }
 0x154   : > { %991 = vst [vmem:[#allocation2 + $0x8] sm:$0xff] %v961_v7  ;;  %v963_v13 = vadd.f32 %v842_v9, %v427_v5  ;;  %v2092_v34 = vpop.f32.mrf.mxu1  ;;  %v449_v7 = vld [vmem:[#allocation2 + $0xc8] sm:$0xff] }
 0x155   : > { %v844_v15 = vpop.f32.mrf.mxu0  ;;  %1014 = vst.msk [vmem:[#allocation2 + $0xb8] sm:$0xff] %vm992_vm1, %v983_v30  ;;  %v2093_v36 = vadd.f32 %v2092_v34, %v2091_v28 }
 0x156   : > { %994 = vst [vmem:[#allocation2 + $0x18] sm:$0xff] %v963_v13  ;;  %v964_v18 = vadd.f32 %v844_v15, %v428_v10  ;;  %v2094_v39 = vpop.f32.mrf.mxu1  ;;  %v451_v10 = vld [vmem:[#allocation2 + $0xd8] sm:$0xff]  ;;  %v452_v13 = vld [vmem:[#allocation2 + $0xe0] sm:$0xff] }
 0x157   : > { %v848_v20 = vpop.f32.mrf.mxu0  ;;  %v986_v41 = vadd.f32 %v2093_v36, %v450_v33 }
 0x158   : > { %995 = vst [vmem:[#allocation2 + $0x20] sm:$0xff] %v964_v18  ;;  %v966_v24 = vadd.f32 %v848_v20, %v430_v16  ;;  %v2095_v45 = vpop.f32.mrf.mxu1 }
 0x159   : > { %v850_v26 = vpop.f32.mrf.mxu0  ;;  %1017 = vst.msk [vmem:[#allocation2 + $0xd0] sm:$0xff] %vm992_vm1, %v986_v41  ;;  %v2096_v47 = vadd.f32 %v2095_v45, %v2094_v39 }
 0x15a   : > { %997 = vst [vmem:[#allocation2 + $0x30] sm:$0xff] %v966_v24  ;;  %v967_v29 = vadd.f32 %v850_v26, %v431_v21 }
 0x15b   : > { %v852_v31 = vpop.f32.mrf.mxu0  ;;  %v989_v51 = vadd.f32 %v2096_v47, %v453_v44 }
 0x15c   : > { %998 = vst [vmem:[#allocation2 + $0x38] sm:$0xff] %v967_v29  ;;  %v969_v35 = vadd.f32 %v852_v31, %v433_v27 }
 0x15d   : > { %v854_v37 = vpop.f32.mrf.mxu0  ;;  %1020 = vst.msk [vmem:[#allocation2 + $0xe8] sm:$0xff] %vm992_vm1, %v989_v51 }
 0x15e   : > { %1000 = vst [vmem:[#allocation2 + $0x48] sm:$0xff] %v969_v35  ;;  %v970_v40 = vadd.f32 %v854_v37, %v434_v32 }
 0x15f   : > { %v858_v42 = vpop.f32.mrf.mxu0 }
 0x160   : > { %1001 = vst [vmem:[#allocation2 + $0x50] sm:$0xff] %v970_v40  ;;  %v972_v46 = vadd.f32 %v858_v42, %v436_v38 }
 0x161   : > { %v860_v48 = vpop.f32.mrf.mxu0 }
 0x162   : > { %1003 = vst [vmem:[#allocation2 + $0x60] sm:$0xff] %v972_v46  ;;  %v973_v50 = vadd.f32 %v860_v48, %v437_v43 }
 0x163   : > { %v862_v52 = vpop.f32.mrf.mxu0 }
 0x164   : > { %1004 = vst [vmem:[#allocation2 + $0x68] sm:$0xff] %v973_v50  ;;  %v975_v54 = vadd.f32 %v862_v52, %v439_v49 }
 0x165   : > { %v864_v55 = vpop.f32.mrf.mxu0 }
 0x166   : > { %1006 = vst [vmem:[#allocation2 + $0x78] sm:$0xff] %v975_v54  ;;  %v976_v57 = vadd.f32 %v864_v55, %v440_v53 }
 0x167   : > { %v868_v58 = vpop.f32.mrf.mxu0 }
 0x168   : > { %1007 = vst [vmem:[#allocation2 + $0x80] sm:$0xff] %v976_v57  ;;  %v978_v60 = vadd.f32 %v868_v58, %v442_v56 }
 0x169   : > { %v870_v61 = vpop.f32.mrf.mxu0 }
 0x16a   : > { %1009 = vst [vmem:[#allocation2 + $0x90] sm:$0xff] %v978_v60  ;;  %v979_v63 = vadd.f32 %v870_v61, %v443_v59 }
 0x16b   : > { %v872_v0 = vpop.f32.mrf.mxu0 }
 0x16c   : > { %1010 = vst [vmem:[#allocation2 + $0x98] sm:$0xff] %v979_v63  ;;  %v981_v2 = vadd.f32 %v872_v0, %v445_v62 }
 0x16d   : > { %v874_v3 = vpop.f32.mrf.mxu0 }
 0x16e   : > { %1012 = vst [vmem:[#allocation2 + $0xa8] sm:$0xff] %v981_v2  ;;  %v982_v5 = vadd.f32 %v874_v3, %v446_v1 }
 0x16f   : > { %v878_v6 = vpop.f32.mrf.mxu0 }
 0x170   : > { %1013 = vst [vmem:[#allocation2 + $0xb0] sm:$0xff] %v982_v5  ;;  %v984_v8 = vadd.f32 %v878_v6, %v448_v4 }
 0x171   : > { %v880_v9 = vpop.f32.mrf.mxu0 }
 0x172   : > { %1015 = vst [vmem:[#allocation2 + $0xc0] sm:$0xff] %v984_v8  ;;  %v985_v11 = vadd.f32 %v880_v9, %v449_v7 }
 0x173   : > { %v882_v12 = vpop.f32.mrf.mxu0 }
 0x174   : > { %1016 = vst [vmem:[#allocation2 + $0xc8] sm:$0xff] %v985_v11  ;;  %v987_v14 = vadd.f32 %v882_v12, %v451_v10  ;;  %1024 = sbr.rel (%p2006_p13) target bundleno = 963 (0x3c3), region = 71 }
 0x175   : > { %v884_v15 = vpop.f32.mrf.mxu0 }
 0x176   : > { %1018 = vst [vmem:[#allocation2 + $0xd8] sm:$0xff] %v987_v14  ;;  %v988_v16 = vadd.f32 %v884_v15, %v452_v13 }
 0x178   : > { %1019 = vst [vmem:[#allocation2 + $0xe0] sm:$0xff] %v988_v16 }
 0x179   : > { %v2695_v17 = vld [vmem:[%s2590_s25] sm:$0x7]  ;;  %v2701_v19 = vld [vmem:[%s2600_s9 + $0x4] sm:$0xf]  ;;  %v2704_v20 = vld [vmem:[%s2600_s9 + $0x8] sm:$0xf] }
 0x17a   : > { %v2698_v18 = vld [vmem:[%s2600_s9] sm:$0xf]  ;;  %v2707_v21 = vld [vmem:[%s2600_s9 + $0xc] sm:$0xf]  ;;  %v2710_v22 = vld [vmem:[%s2600_s9 + $0x10] sm:$0xf] }
 0x17b   : > { %v2713_v23 = vld [vmem:[%s2600_s9 + $0x14] sm:$0xf]  ;;  %v2716_v24 = vld [vmem:[%s2600_s9 + $0x18] sm:$0xf]  ;;  %v2719_v25 = vld [vmem:[%s2600_s9 + $0x1c] sm:$0xf] }
 0x17c   : > { %v2722_v26 = vld [vmem:[%s2600_s9 + $0x20] sm:$0xf]  ;;  %v2725_v27 = vld [vmem:[%s2600_s9 + $0x24] sm:$0xf]  ;;  %v2728_v28 = vld [vmem:[%s2600_s9 + $0x28] sm:$0xf] }
 0x17d   : > { %v2731_v29 = vld [vmem:[%s2600_s9 + $0x2c] sm:$0xf]  ;;  %v2734_v30 = vld [vmem:[%s2600_s9 + $0x30] sm:$0xf]  ;;  %v2737_v31 = vld [vmem:[%s2600_s9 + $0x34] sm:$0xf] }
 0x17e   : > { %v2740_v32 = vld [vmem:[%s2600_s9 + $0x38] sm:$0xf]  ;;  %v2743_v33 = vld [vmem:[%s2600_s9 + $0x3c] sm:$0xf]  ;;  %v2746_v34 = vld [vmem:[%s2600_s9 + $0x40] sm:$0xf] }
 0x17f   : > { %v2749_v35 = vld [vmem:[%s2600_s9 + $0x44] sm:$0xf]  ;;  %v2752_v36 = vld [vmem:[%s2600_s9 + $0x48] sm:$0xf]  ;;  %v2755_v37 = vld [vmem:[%s2600_s9 + $0x4c] sm:$0xf] }
 0x180   : > { %v2758_v38 = vld [vmem:[%s2600_s9 + $0x50] sm:$0xf]  ;;  %v2761_v39 = vld [vmem:[%s2600_s9 + $0x54] sm:$0xf]  ;;  %v2764_v40 = vld [vmem:[%s2600_s9 + $0x58] sm:$0xf] }
 0x181   : > { %v2767_v41 = vld [vmem:[%s2600_s9 + $0x5c] sm:$0xf]  ;;  %v2770_v42 = vld [vmem:[%s2600_s9 + $0x60] sm:$0xf]  ;;  %v2773_v43 = vld [vmem:[%s2600_s9 + $0x64] sm:$0xf] }
 0x182   : > { %v2776_v44 = vld [vmem:[%s2600_s9 + $0x68] sm:$0xf]  ;;  %v2779_v45 = vld [vmem:[%s2600_s9 + $0x6c] sm:$0xf]  ;;  %v2782_v46 = vld [vmem:[%s2600_s9 + $0x70] sm:$0xf] }
 0x183   : > { %v2785_v47 = vld [vmem:[%s2600_s9 + $0x74] sm:$0xf]  ;;  %v2788_v48 = vld [vmem:[%s2600_s9 + $0x78] sm:$0xf]  ;;  %v2791_v49 = vld [vmem:[%s2600_s9 + $0x7c] sm:$0xf] }
 0x184   : > { %v2794_v50 = vld [vmem:[%s2600_s9 + $0x80] sm:$0xf]  ;;  %v2797_v51 = vld [vmem:[%s2600_s9 + $0x84] sm:$0xf]  ;;  %v2800_v52 = vld [vmem:[%s2600_s9 + $0x88] sm:$0xf] }
 0x185   : > { %v2803_v53 = vld [vmem:[%s2600_s9 + $0x8c] sm:$0xf]  ;;  %v2806_v54 = vld [vmem:[%s2600_s9 + $0x90] sm:$0xf]  ;;  %v2809_v55 = vld [vmem:[%s2600_s9 + $0x94] sm:$0x3] }
 0x186   : > { %v2816_v56 = vld [vmem:[%s3004_s22] sm:$0x1]  ;;  %1068 = sbr.rel (%p2007_p0) target bundleno = 653 (0x28d), region = 75 }
 0x18b   : > { %v2023_v57 = vcombine.low %v2788_v48, %v2791_v49  ;;  %v2015_v58 = vcombine.low %v2740_v32, %v2743_v33  ;;  %v2022_v59 = vcombine.low %v2782_v46, %v2785_v47  ;;  %v2014_v60 = vcombine.low %v2734_v30, %v2737_v31  ;;  %v1070_v11 = vld [vmem:[#allocation2 + $0x8] sm:$0xff]  ;;  %v1069_v12 = vld [vmem:[#allocation2] sm:$0xff]  ;;  %v1071_v13 = vld [vmem:[#allocation2 + $0x10] sm:$0xff] }
 0x18c   : > { %v2428_v61 = vmov 0.0   ;;  %v2026_v62 = vcombine.low %v2806_v54, %v2809_v55  ;;  %vm1232_vm2 = vcmask 1045504   ;;  %v2021_v63 = vcombine.low %v2776_v44, %v2779_v45 }
 0x18d   : > { %2097 = vmatprep.subr.bf16.mxu0 %v2023_v57  ;;  %2149 = vmatprep.subr.bf16.mxu1 %v2428_v61  ;;  %v1073_v1 = vlaneseq  ;;  %v2025_v2 = vcombine.low %v2800_v52, %v2803_v53  ;;  %vm2429_vm3 = vmmov 0   ;;  %v2013_v3 = vcombine.low %v2728_v28, %v2731_v29 }
 0x18e   : > { %2098 = vmatpush3.bf16.msra.mxu0 %v2015_v58  ;;  %v1234_v0 = vsel %vm1232_vm2, %v2026_v62, 0  ;;  %2155 = vmatprep.mubr.msk.bf16.mxu1 %vm2429_vm3, %v2428_v61  ;;  %v2020_v5 = vcombine.low %v2770_v42, %v2773_v43  ;;  %v2012_v9 = vcombine.low %v2722_v26, %v2725_v27  ;;  %v2024_v10 = vcombine.low %v2794_v50, %v2797_v51 }
 0x18f   : > { %2099 = vmatprep.subr.bf16.mxu0 %v2022_v59  ;;  %2150 = vmatpush3.bf16.msra.mxu1 %v1234_v0  ;;  %v1074_v4 = vshrl.u32 %v1073_v1, 7  ;;  %v2019_v57 = vcombine.low %v2764_v40, %v2767_v41  ;;  %v2011_v62 = vcombine.low %v2716_v24, %v2719_v25  ;;  %v2017_v0 = vcombine.low %v2752_v36, %v2755_v37 }
 0x190   : > { %2151 = vmatprep.subr.bf16.mxu1 %v2428_v61  ;;  %v2009_v1 = vcombine.low %v2704_v20, %v2707_v21  ;;  %vm1317_vm4 = vcmask 1040384  }
 0x191   : > { %v1079_v6 = vsub.s32 1, %v1074_v4  ;;  %v1075_v7 = vsub.s32 0, %v1074_v4  ;;  %v1083_v8 = vsub.s32 2, %v1074_v4 }
 0x192   : > { %2100 = vmatpush3.bf16.msra.mxu0 %v2014_v60 }
 0x193   : > { %2101 = vmatprep.subr.bf16.mxu0 %v2021_v63  ;;  %2152 = vmatpush3.bf16.msra.mxu1 %v2025_v2  ;;  %v1080_v14 = vrot.slane %v2695_v17, %v1079_v6  ;;  %v1076_v15 = vrot.slane %v2695_v17, %v1075_v7  ;;  %v1084_v16 = vrot.slane %v2695_v17, %v1083_v8 }
 0x194   : > { %2153 = vmatprep.subr.bf16.mxu1 %v2428_v61  ;;  %v2018_v61 = vcombine.low %v2758_v38, %v2761_v39  ;;  %v2010_v63 = vcombine.low %v2710_v22, %v2713_v23  ;;  %v2016_v2 = vcombine.low %v2746_v34, %v2749_v35 }
 0x195   : > { %v1089_v58 = vadd.f32 %v1080_v14, %v1070_v11  ;;  %v1088_v59 = vadd.f32 %v1076_v15, %v1069_v12  ;;  %v1090_v60 = vadd.f32 %v1084_v16, %v1071_v13 }
 0x196   : > { %2102 = vmatpush3.bf16.msra.mxu0 %v2013_v3  ;;  %v2008_v3 = vcombine.low %v2698_v18, %v2701_v19 }
 0x197   : > { %2103 = vmatprep.subr.bf16.mxu0 %v2020_v5  ;;  %2154 = vmatpush3.bf16.msra.mxu1 %v2024_v10  ;;  %2301 = vtanh.f32 %v1089_v58 }
 0x198   : > { %2303 = vtanh.f32 %v1088_v59 }
 0x199   : > { %2305 = vtanh.f32 %v1090_v60 }
 0x19a   : > { %2104 = vmatpush3.bf16.msra.mxu0 %v2012_v9 }
 0x19b   : > { %2105 = vmatprep.subr.bf16.mxu0 %v2019_v57 }
 0x19e   : > { %2106 = vmatpush3.bf16.msra.mxu0 %v2011_v62 }
 0x19f   : > { %2107 = vmatprep.subr.bf16.mxu0 %v2018_v61 }
 0x1a2   : > { %2108 = vmatpush3.bf16.msra.mxu0 %v2010_v63 }
 0x1a3   : > { %2109 = vmatprep.subr.bf16.mxu0 %v2017_v0 }
 0x1a4   : > { %v2302_v4 = vpop.eup %2301 }
 0x1a5   : > { %v2304_v5 = vpop.eup %2303  ;;  %v1100_v6 = vrot.slane %v2302_v4, 4 }
 0x1a6   : > { %2110 = vmatpush3.bf16.msra.mxu0 %v2009_v1  ;;  %v2306_v7 = vpop.eup %2305  ;;  %v1094_v8 = vrot.slane %v2304_v5, 4 }
 0x1a7   : > { %2111 = vmatprep.subr.bf16.mxu0 %v2016_v2  ;;  %v1101_v9 = vmax.f32 %v2302_v4, %v1100_v6  ;;  %v1106_v10 = vsel %vm992_vm1, %v2306_v7, -inf }
 0x1a8   : > { %v1095_v11 = vmax.f32 %v2304_v5, %v1094_v8  ;;  %v1107_v12 = vrot.slane %v1106_v10, 4 }
 0x1a9   : > { %v1102_v13 = vrot.slane %v1101_v9, 2 }
 0x1aa   : > { %2112 = vmatpush3.bf16.msra.mxu0 %v2008_v3  ;;  %v1096_v14 = vrot.slane %v1095_v11, 2  ;;  %v1108_v15 = vmax.f32 %v1106_v10, %v1107_v12 }
 0x1ab   : > { %v1103_v16 = vmax.f32 %v1101_v9, %v1102_v13 }
 0x1ac   : > { %v1097_v57 = vmax.f32 %v1095_v11, %v1096_v14  ;;  %v1109_v58 = vrot.slane %v1108_v15, 2 }
 0x1ad   : > { %v1104_v59 = vrot.slane %v1103_v16, 1 }
 0x1ae   : > { %v1098_v60 = vrot.slane %v1097_v57, 1  ;;  %v1110_v62 = vmax.f32 %v1108_v15, %v1109_v58 }
 0x1af   : > { %v1105_v61 = vmax.f32 %v1103_v16, %v1104_v59 }
 0x1b0   : > { %v1099_v63 = vmax.f32 %v1097_v57, %v1098_v60  ;;  %v1111_v0 = vrot.slane %v1110_v62, 1 }
 0x1b1   : > { %v1114_v1 = vpack.c.bf16 %v1105_v61, %v1105_v61 }
 0x1b2   : > { %v1113_v2 = vpack.c.bf16 %v1099_v63, %v1099_v63  ;;  %v1112_v3 = vmax.f32 %v1110_v62, %v1111_v0 }
 0x1b3   : > { %1268 = vmatprep.mubr.bf16.mxu0 %v1114_v1 }
 0x1b4   : > { %1269 = vmatmul.mubr.bf16.vlgmr.msra.gmra.mxu0 %v1113_v2  ;;  %v1115_v4 = vpack.c.bf16 %v1112_v3, %v1112_v3 }
 0x1b6   : > { %2156 = vmatmul.mubr.msk.bf16.vlgmr.msra.gmra.mxu1 %vm992_vm1, %v1115_v4 }
 0x274   : > { %v2113_v5 = vpop.f32.mrf.mxu0 }
 0x276   : > { %v1310_v6 = vpop.f32.mrf.mxu1  ;;  %v2114_v7 = vpop.f32.mrf.mxu0 }
 0x277   : > { %v2115_v8 = vadd.f32 %v2114_v7, %v2113_v5 }
 0x278   : > { %v2157_v9 = vpop.f32.mrf.mxu1  ;;  %v2116_v10 = vpop.f32.mrf.mxu0 }
 0x279   : > { %v1271_v11 = vadd.f32 %v2115_v8, %v2816_v56 }
 0x27a   : > { %v1313_v12 = vpop.f32.mrf.mxu1  ;;  %v2117_v13 = vpop.f32.mrf.mxu0 }
 0x27b   : > { %v1311_v14 = vadd.f32 %v1310_v6, %v1271_v11 }
 0x27c   : > { %v2158_v15 = vpop.f32.mrf.mxu1 }
 0x27d   : > { %2307 = vtanh.f32 %v1311_v14 }
 0x28a   : > { %v2308_v16 = vpop.eup %2307 }
 0x28b   : > { %v1318_v57 = vsel %vm1317_vm4, %v2308_v16, 0.0 }
 0x28c   : > { %1319 = vst [vmem:[%s2584_s14] sm:$0x1f] %v1318_v57 }
 0x28d PF: > { %p2028_p1 = scmp.ne.s32.totalorder %s2413_s21, 1 }
 0x28f   : > { %1323 = sbr.rel (%p2028_p1) target bundleno = 963 (0x3c3), region = 79 }
 0x294   : > { %v2044_v58 = vcombine.low %v2788_v48, %v2791_v49  ;;  %v2036_v59 = vcombine.low %v2740_v32, %v2743_v33  ;;  %v2043_v60 = vcombine.low %v2782_v46, %v2785_v47  ;;  %v2035_v62 = vcombine.low %v2734_v30, %v2737_v31  ;;  %v1325_v47 = vld [vmem:[#allocation2 + $0x8] sm:$0xff]  ;;  %v1343_v2 = vld [vmem:[#allocation2 + $0x98] sm:$0xff]  ;;  %v1352_v6 = vld [vmem:[#allocation2 + $0xe0] sm:$0xff] }
 0x295   : > { %v2430_v61 = vmov 0.0   ;;  %v2047_v63 = vcombine.low %v2806_v54, %v2809_v55  ;;  %vm1733_vm5 = vcmask 1045504   ;;  %v2042_v48 = vcombine.low %v2776_v44, %v2779_v45  ;;  %v1340_v55 = vld [vmem:[#allocation2 + $0x80] sm:$0xff]  ;;  %v1330_v12 = vld [vmem:[#allocation2 + $0x30] sm:$0xff]  ;;  %v1333_v13 = vld [vmem:[#allocation2 + $0x48] sm:$0xff] }
 0x296   : > { %2123 = vmatprep.subr.bf16.mxu0 %v2044_v58  ;;  %2159 = vmatprep.subr.bf16.mxu1 %v2430_v61  ;;  %v1355_v32 = vlaneseq  ;;  %v2046_v33 = vcombine.low %v2800_v52, %v2803_v53  ;;  %v2034_v30 = vcombine.low %v2728_v28, %v2731_v29  ;;  %v2041_v46 = vcombine.low %v2770_v42, %v2773_v43  ;;  %v1328_v52 = vld [vmem:[#allocation2 + $0x20] sm:$0xff]  ;;  %v1331_v53 = vld [vmem:[#allocation2 + $0x38] sm:$0xff]  ;;  %v1334_v29 = vld [vmem:[#allocation2 + $0x50] sm:$0xff] }
 0x297   : > { %2124 = vmatpush3.bf16.msra.mxu0 %v2036_v59  ;;  %v1735_v49 = vsel %vm1733_vm5, %v2047_v63, 0  ;;  %vm2431_vm6 = vmmov 0   ;;  %v2045_v45 = vcombine.low %v2794_v50, %v2797_v51  ;;  %v2033_v28 = vcombine.low %v2722_v26, %v2725_v27  ;;  %v1337_v43 = vld [vmem:[#allocation2 + $0x68] sm:$0xff]  ;;  %v1346_v27 = vld [vmem:[#allocation2 + $0xb0] sm:$0xff]  ;;  %v1336_v15 = vld [vmem:[#allocation2 + $0x60] sm:$0xff] }
 0x298   : > { %2125 = vmatprep.subr.bf16.mxu0 %v2043_v60  ;;  %2160 = vmatpush3.bf16.msra.mxu1 %v1735_v49  ;;  %v2881_v31 = vshrl.u32 %v1355_v32, 7  ;;  %v2040_v42 = vcombine.low %v2764_v40, %v2767_v41  ;;  %v2032_v26 = vcombine.low %v2716_v24, %v2719_v25  ;;  %v2039_v40 = vcombine.low %v2758_v38, %v2761_v39  ;;  %v1349_v41 = vld [vmem:[#allocation2 + $0xc8] sm:$0xff]  ;;  %v1324_v24 = vld [vmem:[#allocation2] sm:$0xff]  ;;  %v1327_v38 = vld [vmem:[#allocation2 + $0x18] sm:$0xff] }
 0x299   : > { %2161 = vmatprep.subr.bf16.mxu1 %v2430_v61  ;;  %2165 = vmatprep.mubr.msk.bf16.mxu1 %vm2431_vm6, %v2430_v61  ;;  %v2031_v25 = vcombine.low %v2710_v22, %v2713_v23  ;;  %v2038_v39 = vcombine.low %v2752_v36, %v2755_v37  ;;  %v2030_v22 = vcombine.low %v2704_v20, %v2707_v21  ;;  %v1339_v23 = vld [vmem:[#allocation2 + $0x78] sm:$0xff]  ;;  %v1342_v37 = vld [vmem:[#allocation2 + $0x90] sm:$0xff]  ;;  %v1345_v60 = vld [vmem:[#allocation2 + $0xa8] sm:$0xff]  ;;  %vm1596_vm7 = vcmask 1041409  }
 0x29a   : > { %v1361_v44 = vsub.s32 1, %v2881_v31  ;;  %v1357_v51 = vsub.s32 0, %v2881_v31  ;;  %v1365_v58 = vsub.s32 2, %v2881_v31  ;;  %v2037_v36 = vcombine.low %v2746_v34, %v2749_v35  ;;  %v1351_v21 = vld [vmem:[#allocation2 + $0xd8] sm:$0xff]  ;;  %v1326_v32 = vld [vmem:[#allocation2 + $0x10] sm:$0xff] }
 0x29b   : > { %2126 = vmatpush3.bf16.msra.mxu0 %v2035_v62  ;;  %v2029_v20 = vcombine.low %v2698_v18, %v2701_v19  ;;  %vm1598_vm8 = vcmask 1042434   ;;  %vm1600_vm9 = vcmask 1043459   ;;  %vm1602_vm10 = vcmask 1044484  }
 0x29c   : > { %2127 = vmatprep.subr.bf16.mxu0 %v2042_v48  ;;  %2162 = vmatpush3.bf16.msra.mxu1 %v2046_v33  ;;  %v1362_v54 = vrot.slane %v2695_v17, %v1361_v44  ;;  %v1358_v8 = vrot.slane %v2695_v17, %v1357_v51  ;;  %v2913_v49 = vrot.slane %v2695_v17, %v1365_v58 }
 0x29d   : > { %2163 = vmatprep.subr.bf16.mxu1 %v2430_v61  ;;  %v1348_v61 = vld [vmem:[#allocation2 + $0xc0] sm:$0xff] }
 0x29e   : > { %v1371_v0 = vadd.f32 %v1362_v54, %v1325_v47  ;;  %v1374_v1 = vadd.f32 %v1362_v54, %v1328_v52  ;;  %v1377_v50 = vadd.f32 %v1362_v54, %v1331_v53  ;;  %v1380_v3 = vadd.f32 %v1362_v54, %v1334_v29  ;;  %v1329_v47 = vld [vmem:[#allocation2 + $0x28] sm:$0xff]  ;;  %v1335_v29 = vld [vmem:[#allocation2 + $0x58] sm:$0xff] }
 0x29f   : > { %2128 = vmatpush3.bf16.msra.mxu0 %v2034_v30  ;;  %v1383_v4 = vadd.f32 %v1362_v54, %v1337_v43  ;;  %v1386_v5 = vadd.f32 %v1362_v54, %v1340_v55  ;;  %v1389_v7 = vadd.f32 %v1362_v54, %v1343_v2  ;;  %v1392_v9 = vadd.f32 %v1362_v54, %v1346_v27  ;;  %v1341_v2 = vld [vmem:[#allocation2 + $0x88] sm:$0xff] }
 0x2a0   : > { %2129 = vmatprep.subr.bf16.mxu0 %v2041_v46  ;;  %2164 = vmatpush3.bf16.msra.mxu1 %v2045_v45  ;;  %2309 = vtanh.f32 %v1371_v0  ;;  %v1395_v10 = vadd.f32 %v1362_v54, %v1349_v41  ;;  %v1398_v11 = vadd.f32 %v1362_v54, %v1352_v6  ;;  %v1370_v14 = vadd.f32 %v1358_v8, %v1324_v24 }
 0x2a1   : > { %2311 = vtanh.f32 %v1374_v1  ;;  %v1373_v16 = vadd.f32 %v1358_v8, %v1327_v38  ;;  %v1376_v57 = vadd.f32 %v1358_v8, %v1330_v12  ;;  %v1379_v59 = vadd.f32 %v1358_v8, %v1333_v13 }
 0x2a2   : > { %2313 = vtanh.f32 %v1377_v50  ;;  %v1382_v62 = vadd.f32 %v1358_v8, %v1336_v15  ;;  %v1385_v63 = vadd.f32 %v1358_v8, %v1339_v23  ;;  %v1388_v48 = vadd.f32 %v1358_v8, %v1342_v37  ;;  %v1338_v50 = vld [vmem:[#allocation2 + $0x70] sm:$0xff]  ;;  %v1353_v15 = vld [vmem:[#allocation2 + $0xe8] sm:$0xff] }
 0x2a3   : > { %2130 = vmatpush3.bf16.msra.mxu0 %v2033_v28  ;;  %2315 = vtanh.f32 %v1380_v3  ;;  %v1391_v35 = vadd.f32 %v1358_v8, %v1345_v60  ;;  %v1394_v30 = vadd.f32 %v1358_v8, %v1348_v61  ;;  %v1397_v45 = vadd.f32 %v1358_v8, %v1351_v21  ;;  %v1332_v28 = vld [vmem:[#allocation2 + $0x40] sm:$0xff]  ;;  %v1347_v8 = vld [vmem:[#allocation2 + $0xb8] sm:$0xff] }
 0x2a4   : > { %2131 = vmatprep.subr.bf16.mxu0 %v2040_v42  ;;  %2317 = vtanh.f32 %v1383_v4  ;;  %v1372_v19 = vadd.f32 %v2913_v49, %v1326_v32  ;;  %v1375_v42 = vadd.f32 %v2913_v49, %v1329_v47  ;;  %v1344_v3 = vld [vmem:[#allocation2 + $0xa0] sm:$0xff]  ;;  %v1378_v27 = vadd.f32 %v2913_v49, %v1332_v28 }
 0x2a5   : > { %2319 = vtanh.f32 %v1386_v5  ;;  %v1381_v4 = vadd.f32 %v2913_v49, %v1335_v29  ;;  %v2924_v38 = vadd.f32 %v2913_v49, %v1344_v3  ;;  %v2927_v23 = vadd.f32 %v2913_v49, %v1347_v8 }
 0x2a6   : > { %2321 = vtanh.f32 %v1389_v7 }
 0x2a7   : > { %2132 = vmatpush3.bf16.msra.mxu0 %v2032_v26  ;;  %2323 = vtanh.f32 %v1392_v9  ;;  %v1350_v9 = vld [vmem:[#allocation2 + $0xd0] sm:$0xff] }
 0x2a8   : > { %2133 = vmatprep.subr.bf16.mxu0 %v2039_v40  ;;  %2325 = vtanh.f32 %v1395_v10  ;;  %v2921_v10 = vadd.f32 %v2913_v49, %v1341_v2 }
 0x2a9   : > { %2327 = vtanh.f32 %v1398_v11 }
 0x2aa   : > { %2329 = vtanh.f32 %v1370_v14 }
 0x2ab   : > { %2134 = vmatpush3.bf16.msra.mxu0 %v2031_v25  ;;  %2331 = vtanh.f32 %v1373_v16  ;;  %v1384_v25 = vadd.f32 %v2913_v49, %v1338_v50 }
 0x2ac   : > { %2135 = vmatprep.subr.bf16.mxu0 %v2038_v39  ;;  %2333 = vtanh.f32 %v1376_v57  ;;  %v2930_v57 = vadd.f32 %v2913_v49, %v1350_v9 }
 0x2ad   : > { %v2310_v34 = vpop.eup %2309  ;;  %2335 = vtanh.f32 %v1379_v59 }
 0x2ae   : > { %v2312_v33 = vpop.eup %2311  ;;  %2337 = vtanh.f32 %v1382_v62 }
 0x2af   : > { %2136 = vmatpush3.bf16.msra.mxu0 %v2030_v22  ;;  %v2314_v46 = vpop.eup %2313  ;;  %v1437_v44 = vmax.f32 %v2310_v34, %v2312_v33  ;;  %2339 = vtanh.f32 %v1385_v63 }
 0x2b0   : > { %2137 = vmatprep.subr.bf16.mxu0 %v2037_v36  ;;  %v2316_v18 = vpop.eup %2315  ;;  %2341 = vtanh.f32 %v1388_v48 }
 0x2b1   : > { %v2318_v17 = vpop.eup %2317  ;;  %v1438_v52 = vrot.slane %v1437_v44, 4  ;;  %v1460_v53 = vmax.f32 %v2314_v46, %v2316_v18  ;;  %2343 = vtanh.f32 %v1391_v35 }
 0x2b2   : > { %v2320_v54 = vpop.eup %2319  ;;  %2345 = vtanh.f32 %v1394_v30 }
 0x2b3   : > { %2138 = vmatpush3.bf16.msra.mxu0 %v2029_v20  ;;  %v2322_v43 = vpop.eup %2321  ;;  %v1439_v55 = vmax.f32 %v1437_v44, %v1438_v52  ;;  %v1461_v0 = vrot.slane %v1460_v53, 4  ;;  %v1483_v1 = vmax.f32 %v2318_v17, %v2320_v54  ;;  %2347 = vtanh.f32 %v1397_v45 }
 0x2b4   : > { %v2324_v26 = vpop.eup %2323  ;;  %2349 = vtanh.f32 %v1372_v19  ;;  %v2933_v20 = vadd.f32 %v2913_v49, %v1353_v15 }
 0x2b5   : > { %v2326_v40 = vpop.eup %2325  ;;  %v1440_v41 = vrot.slane %v1439_v55, 2  ;;  %v1462_v5 = vmax.f32 %v1460_v53, %v1461_v0  ;;  %v1484_v6 = vrot.slane %v1483_v1, 4  ;;  %v1506_v7 = vmax.f32 %v2322_v43, %v2324_v26 }
 0x2b6   : > { %v2328_v24 = vpop.eup %2327  ;;  %2351 = vtanh.f32 %v1375_v42 }
 0x2b7   : > { %v2330_v39 = vpop.eup %2329  ;;  %v1441_v11 = vmax.f32 %v1439_v55, %v1440_v41  ;;  %v1463_v12 = vrot.slane %v1462_v5, 2  ;;  %v1485_v13 = vmax.f32 %v1483_v1, %v1484_v6  ;;  %v1507_v14 = vrot.slane %v1506_v7, 4 }
 0x2b8   : > { %v2332_v16 = vpop.eup %2331  ;;  %v1529_v22 = vmax.f32 %v2326_v40, %v2328_v24  ;;  %2353 = vtanh.f32 %v1378_v27 }
 0x2b9   : > { %v2334_v58 = vpop.eup %2333  ;;  %v1442_v36 = vrot.slane %v1441_v11, 1  ;;  %v1464_v37 = vmax.f32 %v1462_v5, %v1463_v12  ;;  %v1486_v59 = vrot.slane %v1485_v13, 2  ;;  %v1508_v60 = vmax.f32 %v1506_v7, %v1507_v14 }
 0x2ba   : > { %v2336_v62 = vpop.eup %2335  ;;  %v1530_v61 = vrot.slane %v1529_v22, 4  ;;  %v1430_v63 = vmax.f32 %v2330_v39, %v2332_v16  ;;  %2355 = vtanh.f32 %v1381_v4 }
 0x2bb   : > { %v2338_v21 = vpop.eup %2337  ;;  %v1443_v48 = vmax.f32 %v1441_v11, %v1442_v36  ;;  %v1465_v34 = vrot.slane %v1464_v37, 1  ;;  %v1487_v35 = vmax.f32 %v1485_v13, %v1486_v59  ;;  %v1509_v32 = vrot.slane %v1508_v60, 2 }
 0x2bc   : > { %v2340_v33 = vpop.eup %2339  ;;  %v1531_v30 = vmax.f32 %v1529_v22, %v1530_v61  ;;  %v1431_v46 = vrot.slane %v1430_v63, 4  ;;  %v1453_v44 = vmax.f32 %v2334_v58, %v2336_v62  ;;  %2357 = vtanh.f32 %v1384_v25 }
 0x2bd   : > { %v2342_v45 = vpop.eup %2341  ;;  %v1466_v47 = vmax.f32 %v1464_v37, %v1465_v34  ;;  %v1488_v18 = vrot.slane %v1487_v35, 1  ;;  %v1510_v19 = vmax.f32 %v1508_v60, %v1509_v32  ;;  %v1546_v17 = vpack.c.bf16 %v1443_v48, %v1443_v48 }
 0x2be   : > { %v2344_v52 = vpop.eup %2343  ;;  %v1532_v49 = vrot.slane %v1531_v30, 2  ;;  %v1432_v53 = vmax.f32 %v1430_v63, %v1431_v46  ;;  %v1454_v28 = vrot.slane %v1453_v44, 4  ;;  %v1476_v29 = vmax.f32 %v2338_v21, %v2340_v33 }
 0x2bf   : > { %v2346_v54 = vpop.eup %2345  ;;  %v1489_v42 = vmax.f32 %v1487_v35, %v1488_v18  ;;  %v1511_v43 = vrot.slane %v1510_v19, 1  ;;  %v1549_v55 = vpack.c.bf16 %v1466_v47, %v1466_v47  ;;  %v1582_v0 = vunpack.c.l.b16 %v1546_v17 }
 0x2c0   : > { %v2348_v1 = vpop.eup %2347  ;;  %v1533_v50 = vmax.f32 %v1531_v30, %v1532_v49  ;;  %v1433_v2 = vrot.slane %v1432_v53, 2  ;;  %v1455_v3 = vmax.f32 %v1453_v44, %v1454_v28  ;;  %v1477_v26 = vrot.slane %v1476_v29, 4 }
 0x2c1   : > { %v2350_v27 = vpop.eup %2349  ;;  %v1512_v4 = vmax.f32 %v1510_v19, %v1511_v43  ;;  %v1552_v40 = vpack.c.bf16 %v1489_v42, %v1489_v42  ;;  %v1585_v41 = vunpack.c.l.b16 %v1549_v55  ;;  %v1499_v5 = vmax.f32 %v2342_v45, %v2344_v52 }
 0x2c2   : > { %v1534_v6 = vrot.slane %v1533_v50, 1  ;;  %v1434_v7 = vmax.f32 %v1432_v53, %v1433_v2  ;;  %v1456_v8 = vrot.slane %v1455_v3, 2  ;;  %v1478_v9 = vmax.f32 %v1476_v29, %v1477_v26 }
 0x2c3   : > { %v2352_v24 = vpop.eup %2351  ;;  %v1555_v25 = vpack.c.bf16 %v1512_v4, %v1512_v4  ;;  %v1588_v39 = vunpack.c.l.b16 %v1552_v40  ;;  %v1604_v11 = vsel %vm1596_vm7, %v1585_v41, %v1582_v0  ;;  %v1500_v12 = vrot.slane %v1499_v5, 4 }
 0x2c4   : > { %v1535_v13 = vmax.f32 %v1533_v50, %v1534_v6  ;;  %v1435_v14 = vrot.slane %v1434_v7, 1  ;;  %v1457_v15 = vmax.f32 %v1455_v3, %v1456_v8  ;;  %v1479_v16 = vrot.slane %v1478_v9, 2 }
 0x2c5   : > { %v2354_v22 = vpop.eup %2353  ;;  %v1591_v58 = vunpack.c.l.b16 %v1555_v25  ;;  %v1605_v36 = vsel %vm1598_vm8, %v1588_v39, %v1604_v11  ;;  %v1501_v37 = vmax.f32 %v1499_v5, %v1500_v12  ;;  %v1522_v59 = vmax.f32 %v2346_v54, %v2348_v1 }
 0x2c6   : > { %v1558_v60 = vpack.c.bf16 %v1535_v13, %v1535_v13  ;;  %v1436_v62 = vmax.f32 %v1434_v7, %v1435_v14  ;;  %v1458_v61 = vrot.slane %v1457_v15, 1  ;;  %v1480_v63 = vmax.f32 %v1478_v9, %v1479_v16 }
 0x2c7   : > { %v2356_v21 = vpop.eup %2355  ;;  %v1606_v48 = vsel %vm1600_vm9, %v1591_v58, %v1605_v36  ;;  %v1502_v34 = vrot.slane %v1501_v37, 2  ;;  %v1523_v35 = vrot.slane %v1522_v59, 4  ;;  %2359 = vtanh.f32 %v2921_v10 }
 0x2c8   : > { %v1594_v32 = vunpack.c.l.b16 %v1558_v60  ;;  %v1459_v33 = vmax.f32 %v1457_v15, %v1458_v61  ;;  %v1481_v30 = vrot.slane %v1480_v63, 1  ;;  %v1545_v46 = vpack.c.bf16 %v1436_v62, %v1436_v62 }
 0x2c9   : > { %v2358_v44 = vpop.eup %2357  ;;  %v1503_v45 = vmax.f32 %v1501_v37, %v1502_v34  ;;  %v1524_v47 = vmax.f32 %v1522_v59, %v1523_v35  ;;  %2361 = vtanh.f32 %v2924_v38  ;;  %v1444_v18 = vsel %vm992_vm1, %v2350_v27, -inf }
 0x2ca   : > { %v1607_v19 = vsel %vm1602_vm10, %v1594_v32, %v1606_v48  ;;  %v1482_v17 = vmax.f32 %v1480_v63, %v1481_v30  ;;  %v1548_v52 = vpack.c.bf16 %v1459_v33, %v1459_v33  ;;  %v1581_v49 = vunpack.c.l.b16 %v1545_v46 }
 0x2cb   : > { %v1613_v53 = vpack.c.b16 %v1607_v19, %v1607_v19  ;;  %v1504_v28 = vrot.slane %v1503_v45, 1  ;;  %v1525_v29 = vrot.slane %v1524_v47, 2  ;;  %2363 = vtanh.f32 %v2927_v23 }
 0x2cc   : > { %v1551_v10 = vpack.c.bf16 %v1482_v17, %v1482_v17  ;;  %v1584_v54 = vunpack.c.l.b16 %v1548_v52  ;;  %2365 = vtanh.f32 %v2930_v57  ;;  %v1445_v42 = vsel %vm992_vm1, %v2352_v24, -inf }
 0x2cd   : > { %1769 = vmatprep.mubr.bf16.mxu0 %v1613_v53  ;;  %v1505_v38 = vmax.f32 %v1503_v45, %v1504_v28  ;;  %v1526_v43 = vmax.f32 %v1524_v47, %v1525_v29  ;;  %2367 = vtanh.f32 %v2933_v20  ;;  %v1446_v55 = vmax.f32 %v1444_v18, %v1445_v42 }
 0x2ce   : > { %v1587_v0 = vunpack.c.l.b16 %v1551_v10  ;;  %v1597_v1 = vsel %vm1596_vm7, %v1584_v54, %v1581_v49  ;;  %v1467_v50 = vsel %vm992_vm1, %v2354_v22, -inf  ;;  %v1468_v2 = vsel %vm992_vm1, %v2356_v21, -inf }
 0x2cf   : > { %v1527_v23 = vrot.slane %v1526_v43, 1  ;;  %v1554_v3 = vpack.c.bf16 %v1505_v38, %v1505_v38  ;;  %v1447_v26 = vrot.slane %v1446_v55, 4  ;;  %v1469_v27 = vmax.f32 %v1467_v50, %v1468_v2 }
 0x2d0   : > { %v1599_v57 = vsel %vm1598_vm8, %v1587_v0, %v1597_v1  ;;  %v1490_v8 = vsel %vm992_vm1, %v2358_v44, -inf }
 0x2d1   : > { %v1528_v4 = vmax.f32 %v1526_v43, %v1527_v23  ;;  %v1590_v40 = vunpack.c.l.b16 %v1554_v3  ;;  %v1448_v41 = vmax.f32 %v1446_v55, %v1447_v26  ;;  %v1470_v5 = vrot.slane %v1469_v27, 4 }
 0x2d3   : > { %v1557_v6 = vpack.c.bf16 %v1528_v4, %v1528_v4  ;;  %v1449_v20 = vrot.slane %v1448_v41, 2  ;;  %v1471_v7 = vmax.f32 %v1469_v27, %v1470_v5  ;;  %v1601_v24 = vsel %vm1600_vm9, %v1590_v40, %v1599_v57 }
 0x2d4   : > { %v2360_v9 = vpop.eup %2359 }
 0x2d5   : > { %v1593_v25 = vunpack.c.l.b16 %v1557_v6  ;;  %v1450_v39 = vmax.f32 %v1448_v41, %v1449_v20  ;;  %v1472_v11 = vrot.slane %v1471_v7, 2  ;;  %v1491_v12 = vsel %vm992_vm1, %v2360_v9, -inf }
 0x2d6   : > { %v2362_v13 = vpop.eup %2361  ;;  %v1492_v14 = vmax.f32 %v1490_v8, %v1491_v12  ;;  %v1564_v9 = vrot.slane %v2816_v56, %v1357_v51 }
 0x2d7   : > { %v1603_v15 = vsel %vm1602_vm10, %v1593_v25, %v1601_v24  ;;  %v1451_v16 = vrot.slane %v1450_v39, 1  ;;  %v1473_v22 = vmax.f32 %v1471_v7, %v1472_v11  ;;  %v1513_v58 = vsel %vm992_vm1, %v2362_v13, -inf }
 0x2d8   : > { %v2364_v36 = vpop.eup %2363  ;;  %v1612_v37 = vpack.c.b16 %v1603_v15, %v1603_v15  ;;  %v1493_v59 = vrot.slane %v1492_v14, 4 }
 0x2d9   : > { %v2366_v60 = vpop.eup %2365  ;;  %v1452_v62 = vmax.f32 %v1450_v39, %v1451_v16  ;;  %v1474_v61 = vrot.slane %v1473_v22, 1  ;;  %v1514_v63 = vsel %vm992_vm1, %v2364_v36, -inf }
 0x2da   : > { %v2368_v21 = vpop.eup %2367  ;;  %1770 = vmatmul.mubr.bf16.vlgmr.msra.gmra.mxu0 %v1612_v37  ;;  %v1494_v48 = vmax.f32 %v1492_v14, %v1493_v59  ;;  %v1515_v34 = vmax.f32 %v1513_v58, %v1514_v63  ;;  %v1536_v35 = vsel %vm992_vm1, %v2366_v60, -inf }
 0x2db   : > { %v1475_v32 = vmax.f32 %v1473_v22, %v1474_v61  ;;  %v1537_v33 = vsel %vm992_vm1, %v2368_v21, -inf  ;;  %v1547_v45 = vpack.c.bf16 %v1452_v62, %v1452_v62 }
 0x2dc   : > { %v1495_v30 = vrot.slane %v1494_v48, 2  ;;  %v1516_v46 = vrot.slane %v1515_v34, 4  ;;  %v1538_v44 = vmax.f32 %v1536_v35, %v1537_v33 }
 0x2dd   : > { %v1550_v17 = vpack.c.bf16 %v1475_v32, %v1475_v32  ;;  %v1583_v28 = vunpack.c.l.b16 %v1547_v45 }
 0x2de   : > { %v1496_v47 = vmax.f32 %v1494_v48, %v1495_v30  ;;  %v1517_v18 = vmax.f32 %v1515_v34, %v1516_v46  ;;  %v1539_v19 = vrot.slane %v1538_v44, 4 }
 0x2df   : > { %v1586_v42 = vunpack.c.l.b16 %v1550_v17 }
 0x2e0   : > { %v1497_v52 = vrot.slane %v1496_v47, 1  ;;  %v1518_v49 = vrot.slane %v1517_v18, 2  ;;  %v1540_v53 = vmax.f32 %v1538_v44, %v1539_v19 }
 0x2e1   : > { %v1608_v2 = vsel %vm1596_vm7, %v1586_v42, %v1583_v28 }
 0x2e2   : > { %v1498_v29 = vmax.f32 %v1496_v47, %v1497_v52  ;;  %v1519_v10 = vmax.f32 %v1517_v18, %v1518_v49  ;;  %v1541_v54 = vrot.slane %v1540_v53, 2 }
 0x2e4   : > { %v1520_v38 = vrot.slane %v1519_v10, 1  ;;  %v1542_v43 = vmax.f32 %v1540_v53, %v1541_v54  ;;  %v1553_v55 = vpack.c.bf16 %v1498_v29, %v1498_v29 }
 0x2e6   : > { %v1521_v0 = vmax.f32 %v1519_v10, %v1520_v38  ;;  %v1543_v1 = vrot.slane %v1542_v43, 1  ;;  %v1589_v50 = vunpack.c.l.b16 %v1553_v55 }
 0x2e8   : > { %v1544_v23 = vmax.f32 %v1542_v43, %v1543_v1  ;;  %v1556_v3 = vpack.c.bf16 %v1521_v0, %v1521_v0  ;;  %v1609_v26 = vsel %vm1598_vm8, %v1589_v50, %v1608_v2 }
 0x2ea   : > { %v1559_v27 = vpack.c.bf16 %v1544_v23, %v1544_v23  ;;  %v1592_v57 = vunpack.c.l.b16 %v1556_v3 }
 0x2ec   : > { %v1595_v4 = vunpack.c.l.b16 %v1559_v27  ;;  %v1610_v40 = vsel %vm1600_vm9, %v1592_v57, %v1609_v26 }
 0x2ee   : > { %v1611_v41 = vsel %vm1602_vm10, %v1595_v4, %v1610_v40 }
 0x2ef   : > { %v1614_v5 = vpack.c.b16 %v1611_v41, %v1611_v41 }
 0x2f1   : > { %2166 = vmatmul.mubr.msk.bf16.vlgmr.msra.gmra.mxu1 %vm992_vm1, %v1614_v5 }
 0x39a   : > { %v2139_v6 = vpop.f32.mrf.mxu0 }
 0x39c   : > { %v2140_v20 = vpop.f32.mrf.mxu0 }
 0x39d   : > { %v2141_v24 = vadd.f32 %v2140_v20, %v2139_v6 }
 0x39e   : > { %v2142_v7 = vpop.f32.mrf.mxu0 }
 0x39f   : > { %v1772_v25 = vadd.f32 %v2141_v24, %v1564_v9 }
 0x3a0   : > { %v2143_v8 = vpop.f32.mrf.mxu0 }
 0x3b1   : > { %v1811_v39 = vpop.f32.mrf.mxu1 }
 0x3b2   : > { %v1812_v11 = vadd.f32 %v1811_v39, %v1772_v25 }
 0x3b3   : > { %v2167_v12 = vpop.f32.mrf.mxu1 }
 0x3b4   : > { %2369 = vtanh.f32 %v1812_v11 }
 0x3b5   : > { %v1814_v13 = vpop.f32.mrf.mxu1 }
 0x3b7   : > { %v2168_v14 = vpop.f32.mrf.mxu1 }
 0x3c1   : > { %v2370_v15 = vpop.eup %2369 }
 0x3c2   : > { %1818 = vst [vmem:[%s2584_s14] sm:$0x1f] %v2370_v15 }
 0x3c3 PF: > { %s15_s24 = sadd.s32 1, %s2425_s24   ;;  %s3005_s20 = sld [smem:[#allocation4_spill]] }
 0x3c4   : > { %p12_p2 = scmp.ge.s32.totalorder %s15_s24, 8   ;;  %s3006_s21 = sld [smem:[#allocation5_spill]] }
 0x3c5   : > { %s3007_s22 = sld [smem:[#allocation6_spill]]  ;;  %s3009_s18 = smov %s2405_s19 }
 0x3c6   : > { %s3008_s23 = sld [smem:[#allocation7_spill]]  ;;  %s3010_s19 = smov %s2513_s6 }
 0x3c7   :  { %14 = sbr.rel (!%p12_p2) target bundleno = 6 (0x6), region = 126 }

</bundles_post_ra>
